<compile_context>
chip_gen: v5e
topology: v5e:2x2
jax: 0.10.0
libtpu: 0.0.40
codegen_flags: <defaults>
</compile_context>

<pallas_src>
import jax
import jax.numpy as jnp
from jax import lax
from jax.experimental import pallas as pl
from jax.experimental.pallas import tpu as pltpu

# ----------------------------- model config ---------------------------------
VOCAB = 64          # synthetic vocab for the embedding `self.e`
H_DS = 32           # hidden size (stands in for the 7B model's hidden dim)
FFN = 64            # SwiGLU intermediate size (2*FFN = 128 -> lane-dense GEMM)
NUM_LAYERS = 2      # synthetic frozen body depth
NUM_HEADS = 4
HEAD_DIM = H_DS // NUM_HEADS
OUT_DIM = 16        # out_dim = Y_tr.shape[1] in the reference script
OUT_PAD = 128       # lane-dense padded head output; sliced back in the wrapper
SEQ = 8
BATCH = 2
RMS_EPS = 1e-6


def _rmsnorm(x, w):
    # x: (S, H) f32, w: (H,) f32   -- kept f32 on the VPU (no bf16 VPU on v5e)
    var = jnp.mean(x * x, axis=-1, keepdims=True)
    return x * lax.rsqrt(var + RMS_EPS) * w


def _deepseek_kernel(x_ref,              # (S, H)       one sequence's embeds
                     bias_ref,           # (S, S)       additive causal bias
                     wq_ref,             # (L, NH, H, HD) bf16 [q-scale folded]
                     wk_ref,             # (L, NH, H, HD) bf16
                     wv_ref,             # (L, NH, H, HD) bf16
                     wo_ref,             # (L, NH, HD, H) bf16
                     ln1_ref, ln2_ref,   # (L, H) f32
                     w13_ref,            # (L, H, 2F)   bf16 [gate | up]
                     w2_ref,             # (L, F, H)    bf16
                     lnf_ref,            # (1, H) f32
                     wout_ref,           # (H, OUT_PAD) bf16, zero-padded head
                     bout_ref,           # (1, OUT_PAD) f32
                     o_ref):             # (S, OUT_PAD) f32
    h = x_ref[...].astype(jnp.float32)                 # (S, H)
    bias = bias_ref[...]                               # (S, S), 0 / -1e30

    for l in range(NUM_LAYERS):                        # static unrolled layers
        # ---- attention block (head-batched, no per-head lane slices) ---------
        xn = _rmsnorm(h, ln1_ref[l])                                # (S, H) f32
        xnb = jnp.broadcast_to(xn.astype(jnp.bfloat16)[None],
                               (NUM_HEADS, SEQ, H_DS))              # (NH, S, H)
        q = jnp.einsum('nsh,nhd->nsd', xnb, wq_ref[l],
                       preferred_element_type=jnp.float32)          # (NH, S, HD)
        k = jnp.einsum('nsh,nhd->nsd', xnb, wk_ref[l],
                       preferred_element_type=jnp.float32)
        v = jnp.einsum('nsh,nhd->nsd', xnb, wv_ref[l],
                       preferred_element_type=jnp.float32)

        s = jnp.einsum('nqd,nkd->nqk', q, k,
                       preferred_element_type=jnp.float32) + bias   # (NH, S, S)
        s = s - jnp.max(s, axis=-1, keepdims=True)
        p = jnp.exp(s)
        p = p * pl.reciprocal(jnp.sum(p, axis=-1, keepdims=True), approx=True)

        ctx = jnp.einsum('nqk,nkd->nqd', p, v,
                         preferred_element_type=jnp.float32)        # (NH, S, HD)
        # output projection: batched over heads, reduced over the head axis
        attn = jnp.einsum('nsd,ndh->nsh', ctx.astype(jnp.bfloat16), wo_ref[l],
                          preferred_element_type=jnp.float32)       # (NH, S, H)
        h = h + jnp.sum(attn, axis=0)                               # (S, H)

        # ---- SwiGLU MLP block (fused gate/up GEMM, 128-lane output) ----------
        xn = _rmsnorm(h, ln2_ref[l])
        gu = jnp.dot(xn.astype(jnp.bfloat16), w13_ref[l],
                     preferred_element_type=jnp.float32)            # (S, 2F)
        gate = gu[:, :FFN]
        up = gu[:, FFN:]
        act = gate * jax.nn.sigmoid(gate) * up                      # SiLU * up
        h = h + jnp.dot(act.astype(jnp.bfloat16), w2_ref[l],
                        preferred_element_type=jnp.float32)

    # final norm -> last_hidden_state, then the trainable nn.Linear head
    h = _rmsnorm(h, lnf_ref[0])
    out = jnp.dot(h.astype(jnp.bfloat16), wout_ref[...],
                  preferred_element_type=jnp.float32) + bout_ref[...]
    o_ref[...] = out.astype(o_ref.dtype)                            # lane-dense store


def _const_spec(shape):
    nd = len(shape)
    return pl.BlockSpec(shape, lambda b, _n=nd: (0,) * _n)


@jax.jit
def deepseek_forward(inputs_embeds, fused):
    """inputs_embeds: (B, S, H) f32 -> (B, S, OUT_DIM) f32."""
    B, S, H = inputs_embeds.shape
    x2 = inputs_embeds.reshape(B * S, H)                 # free XLA reshape

    # additive causal bias, built once at trace time (constant-folded by XLA)
    tri = jnp.tril(jnp.ones((S, S), jnp.bool_))
    bias = jnp.where(tri, 0.0, -1e30).astype(jnp.float32)

    weight_order = ["wq", "wk", "wv", "wo", "ln1", "ln2",
                    "w13", "w2", "lnf", "wout", "bout"]
    weights = [fused[k] for k in weight_order]

    in_specs = ([pl.BlockSpec((S, H), lambda b: (b, 0)),       # per-sequence rows
                 _const_spec((S, S))]                          # causal bias
                + [_const_spec(tuple(w.shape)) for w in weights])

    out = pl.pallas_call(
        _deepseek_kernel,
        out_shape=jax.ShapeDtypeStruct((B * S, OUT_PAD), jnp.float32),
        grid_spec=pltpu.PrefetchScalarGridSpec(
            num_scalar_prefetch=0,
            grid=(B,),                                   # one sequence per step
            in_specs=in_specs,
            out_specs=pl.BlockSpec((S, OUT_PAD), lambda b: (b, 0)),
        ),
        compiler_params=pltpu.CompilerParams(
            dimension_semantics=("parallel",)),          # both TCs on v7x
    )(x2, bias, *weights)

    return out[:, :OUT_DIM].reshape(B, S, OUT_DIM)       # drop lane padding


def init_params(key):
    ks = jax.random.split(key, 16)
    s = 0.02
    return {
        "embed": jax.random.normal(ks[0], (VOCAB, H_DS), jnp.float32) * s,
        "wq": jax.random.normal(ks[1], (NUM_LAYERS, H_DS, H_DS), jnp.float32) * s,
        "wk": jax.random.normal(ks[2], (NUM_LAYERS, H_DS, H_DS), jnp.float32) * s,
        "wv": jax.random.normal(ks[3], (NUM_LAYERS, H_DS, H_DS), jnp.float32) * s,
        "wo": jax.random.normal(ks[4], (NUM_LAYERS, H_DS, H_DS), jnp.float32) * s,
        "ln1": jnp.ones((NUM_LAYERS, H_DS), jnp.float32),
        "ln2": jnp.ones((NUM_LAYERS, H_DS), jnp.float32),
        "w1": jax.random.normal(ks[5], (NUM_LAYERS, H_DS, FFN), jnp.float32) * s,
        "w3": jax.random.normal(ks[6], (NUM_LAYERS, H_DS, FFN), jnp.float32) * s,
        "w2": jax.random.normal(ks[7], (NUM_LAYERS, FFN, H_DS), jnp.float32) * s,
        "lnf": jnp.ones((1, H_DS), jnp.float32),
        "wout": jax.random.normal(ks[8], (H_DS, OUT_DIM), jnp.float32) * s,
        "bout": jnp.zeros((1, OUT_DIM), jnp.float32),
    }


def fuse_params(p):
    """Trace-time weight fusion / head-major layout / padding / bf16 cast."""
    bf = jnp.bfloat16
    inv_sqrt_hd = 1.0 / (HEAD_DIM ** 0.5)
    # head-major (L, NH, H, HD) so the kernel can run batched head einsums
    wq3 = (p["wq"] * inv_sqrt_hd).reshape(
        NUM_LAYERS, H_DS, NUM_HEADS, HEAD_DIM).transpose(0, 2, 1, 3)
    wk3 = p["wk"].reshape(NUM_LAYERS, H_DS, NUM_HEADS, HEAD_DIM).transpose(0, 2, 1, 3)
    wv3 = p["wv"].reshape(NUM_LAYERS, H_DS, NUM_HEADS, HEAD_DIM).transpose(0, 2, 1, 3)
    wo3 = p["wo"].reshape(NUM_LAYERS, NUM_HEADS, HEAD_DIM, H_DS)
    w13 = jnp.concatenate([p["w1"], p["w3"]], axis=-1)            # (L, H, 128)
    wout = jnp.zeros((H_DS, OUT_PAD), jnp.float32).at[:, :OUT_DIM].set(p["wout"])
    bout = jnp.zeros((1, OUT_PAD), jnp.float32).at[:, :OUT_DIM].set(p["bout"])
    return {
        "wq": wq3.astype(bf), "wk": wk3.astype(bf), "wv": wv3.astype(bf),
        "wo": wo3.astype(bf),
        "ln1": p["ln1"], "ln2": p["ln2"],                         # f32 (VPU path)
        "w13": w13.astype(bf), "w2": p["w2"].astype(bf),
        "lnf": p["lnf"],
        "wout": wout.astype(bf), "bout": bout,                    # bias f32
    }


if __name__ == "__main__":
    key = jax.random.PRNGKey(0)
    params = init_params(key)
    fused = fuse_params(params)

    # token ids -> self.e(x) embedding lookup (glue, plain JAX gather)
    tok_key = jax.random.fold_in(key, 123)
    x_tokens = jax.random.randint(tok_key, (BATCH, SEQ), 0, VOCAB, jnp.int32)
    inputs_embeds = jnp.take(params["embed"], x_tokens, axis=0)   # (B, S, H)

    out = deepseek_forward(inputs_embeds, fused)
    out = jax.block_until_ready(out)
    assert out.shape == (BATCH, SEQ, OUT_DIM)
    assert jnp.all(jnp.isfinite(out))
    print("KERNEL_OK")
</pallas_src>

<mosaic_0001>
module attributes {stable_mosaic.version = 11 : i64} {
  func.func @_deepseek_kernel(%arg0: i32, %arg1: memref<8x32xf32, #tpu.memory_space<vmem>>, %arg2: memref<8x8xf32, #tpu.memory_space<vmem>>, %arg3: memref<2x4x32x8xbf16, #tpu.memory_space<vmem>>, %arg4: memref<2x4x32x8xbf16, #tpu.memory_space<vmem>>, %arg5: memref<2x4x32x8xbf16, #tpu.memory_space<vmem>>, %arg6: memref<2x4x8x32xbf16, #tpu.memory_space<vmem>>, %arg7: memref<2x32xf32, #tpu.memory_space<vmem>>, %arg8: memref<2x32xf32, #tpu.memory_space<vmem>>, %arg9: memref<2x32x128xbf16, #tpu.memory_space<vmem>>, %arg10: memref<2x64x32xbf16, #tpu.memory_space<vmem>>, %arg11: memref<1x32xf32, #tpu.memory_space<vmem>>, %arg12: memref<32x128xbf16, #tpu.memory_space<vmem>>, %arg13: memref<1x128xf32, #tpu.memory_space<vmem>>, %arg14: memref<8x128xf32, #tpu.memory_space<vmem>>) attributes {dimension_semantics = [#tpu.dimension_semantics<parallel>], iteration_bounds = array<i64: 2>, scalar_prefetch = 0 : i64, scratch_operands = 0 : i64, tpu.core_type = #tpu.core_type<tc>, window_params = [{transform_indices = @transform_0, window_bounds = array<i64: 8, 32>}, {pipeline_mode = #tpu.pipeline_mode<synchronous>, transform_indices = @transform_1, window_bounds = array<i64: 8, 8>}, {pipeline_mode = #tpu.pipeline_mode<synchronous>, transform_indices = @transform_2, window_bounds = array<i64: 2, 4, 32, 8>}, {pipeline_mode = #tpu.pipeline_mode<synchronous>, transform_indices = @transform_3, window_bounds = array<i64: 2, 4, 32, 8>}, {pipeline_mode = #tpu.pipeline_mode<synchronous>, transform_indices = @transform_4, window_bounds = array<i64: 2, 4, 32, 8>}, {pipeline_mode = #tpu.pipeline_mode<synchronous>, transform_indices = @transform_5, window_bounds = array<i64: 2, 4, 8, 32>}, {pipeline_mode = #tpu.pipeline_mode<synchronous>, transform_indices = @transform_6, window_bounds = array<i64: 2, 32>}, {pipeline_mode = #tpu.pipeline_mode<synchronous>, transform_indices = @transform_7, window_bounds = array<i64: 2, 32>}, {pipeline_mode = #tpu.pipeline_mode<synchronous>, transform_indices = @transform_8, window_bounds = array<i64: 2, 32, 128>}, {pipeline_mode = #tpu.pipeline_mode<synchronous>, transform_indices = @transform_9, window_bounds = array<i64: 2, 64, 32>}, {pipeline_mode = #tpu.pipeline_mode<synchronous>, transform_indices = @transform_10, window_bounds = array<i64: 1, 32>}, {pipeline_mode = #tpu.pipeline_mode<synchronous>, transform_indices = @transform_11, window_bounds = array<i64: 32, 128>}, {pipeline_mode = #tpu.pipeline_mode<synchronous>, transform_indices = @transform_12, window_bounds = array<i64: 1, 128>}, {transform_indices = @transform_13, window_bounds = array<i64: 8, 128>}]} {
    %c0 = arith.constant 0 : index
    %c0_0 = arith.constant 0 : index
    %0 = vector.load %arg1[%c0, %c0_0] : memref<8x32xf32, #tpu.memory_space<vmem>>, vector<8x32xf32>
    %c0_1 = arith.constant 0 : index
    %c0_2 = arith.constant 0 : index
    %1 = vector.load %arg2[%c0_1, %c0_2] : memref<8x8xf32, #tpu.memory_space<vmem>>, vector<8x8xf32>
    %c0_3 = arith.constant 0 : index
    %c0_4 = arith.constant 0 : index
    %2 = vector.load %arg7[%c0_3, %c0_4] : memref<2x32xf32, #tpu.memory_space<vmem>>, vector<1x32xf32>
    %3 = vector.shape_cast %2 : vector<1x32xf32> to vector<32xf32>
    %4 = arith.mulf %0, %0 : vector<8x32xf32>
    %cst = arith.constant dense<0.000000e+00> : vector<8xf32>
    %5 = vector.multi_reduction <add>, %4, %cst [1] : vector<8x32xf32> to vector<8xf32>
    %6 = vector.shape_cast %5 : vector<8xf32> to vector<8x1xf32>
    %cst_5 = arith.constant 3.200000e+01 : f32
    %7 = vector.broadcast %cst_5 : f32 to vector<8x1xf32>
    %8 = arith.divf %6, %7 : vector<8x1xf32>
    %cst_6 = arith.constant 9.99999997E-7 : f32
    %9 = vector.broadcast %cst_6 : f32 to vector<8x1xf32>
    %10 = arith.addf %8, %9 : vector<8x1xf32>
    %11 = math.rsqrt %10 : vector<8x1xf32>
    %12 = vector.broadcast %11 : vector<8x1xf32> to vector<8x32xf32>
    %13 = arith.mulf %0, %12 : vector<8x32xf32>
    %14 = vector.shape_cast %3 : vector<32xf32> to vector<1x32xf32>
    %15 = vector.broadcast %14 : vector<1x32xf32> to vector<8x32xf32>
    %16 = arith.mulf %13, %15 : vector<8x32xf32>
    %17 = arith.truncf %16 : vector<8x32xf32> to vector<8x32xbf16>
    %18 = vector.shape_cast %17 : vector<8x32xbf16> to vector<1x8x32xbf16>
    %19 = vector.shape_cast %18 : vector<1x8x32xbf16> to vector<1x8x32xbf16>
    %20 = vector.broadcast %19 : vector<1x8x32xbf16> to vector<4x8x32xbf16>
    %c0_7 = arith.constant 0 : index
    %c0_8 = arith.constant 0 : index
    %c0_9 = arith.constant 0 : index
    %c0_10 = arith.constant 0 : index
    %21 = vector.load %arg3[%c0_7, %c0_8, %c0_9, %c0_10] : memref<2x4x32x8xbf16, #tpu.memory_space<vmem>>, vector<1x4x32x8xbf16>
    %22 = vector.shape_cast %21 : vector<1x4x32x8xbf16> to vector<4x32x8xbf16>
    "tpu.trace_start"() <{level = 10 : i32, message = "nsh,nhd->nsd"}> : () -> ()
    %cst_11 = arith.constant dense<0.000000e+00> : vector<4x8x8xf32>
    %23 = tpu.matmul %20, %22, %cst_11 {dimension_numbers = #tpu.dot_dimension_numbers<[2], [1], [1], [2], [0, 0, 0, 1, 1, 2], [0], [0]>} : vector<4x8x32xbf16>, vector<4x32x8xbf16>, vector<4x8x8xf32> -> vector<4x8x8xf32>
    "tpu.trace_stop"() : () -> ()
    %c0_12 = arith.constant 0 : index
    %c0_13 = arith.constant 0 : index
    %c0_14 = arith.constant 0 : index
    %c0_15 = arith.constant 0 : index
    %24 = vector.load %arg4[%c0_12, %c0_13, %c0_14, %c0_15] : memref<2x4x32x8xbf16, #tpu.memory_space<vmem>>, vector<1x4x32x8xbf16>
    %25 = vector.shape_cast %24 : vector<1x4x32x8xbf16> to vector<4x32x8xbf16>
    "tpu.trace_start"() <{level = 10 : i32, message = "nsh,nhd->nsd"}> : () -> ()
    %cst_16 = arith.constant dense<0.000000e+00> : vector<4x8x8xf32>
    %26 = tpu.matmul %20, %25, %cst_16 {dimension_numbers = #tpu.dot_dimension_numbers<[2], [1], [1], [2], [0, 0, 0, 1, 1, 2], [0], [0]>} : vector<4x8x32xbf16>, vector<4x32x8xbf16>, vector<4x8x8xf32> -> vector<4x8x8xf32>
    "tpu.trace_stop"() : () -> ()
    %c0_17 = arith.constant 0 : index
    %c0_18 = arith.constant 0 : index
    %c0_19 = arith.constant 0 : index
    %c0_20 = arith.constant 0 : index
    %27 = vector.load %arg5[%c0_17, %c0_18, %c0_19, %c0_20] : memref<2x4x32x8xbf16, #tpu.memory_space<vmem>>, vector<1x4x32x8xbf16>
    %28 = vector.shape_cast %27 : vector<1x4x32x8xbf16> to vector<4x32x8xbf16>
    "tpu.trace_start"() <{level = 10 : i32, message = "nsh,nhd->nsd"}> : () -> ()
    %cst_21 = arith.constant dense<0.000000e+00> : vector<4x8x8xf32>
    %29 = tpu.matmul %20, %28, %cst_21 {dimension_numbers = #tpu.dot_dimension_numbers<[2], [1], [1], [2], [0, 0, 0, 1, 1, 2], [0], [0]>} : vector<4x8x32xbf16>, vector<4x32x8xbf16>, vector<4x8x8xf32> -> vector<4x8x8xf32>
    "tpu.trace_stop"() : () -> ()
    "tpu.trace_start"() <{level = 10 : i32, message = "nqd,nkd->nqk"}> : () -> ()
    %cst_22 = arith.constant dense<0.000000e+00> : vector<4x8x8xf32>
    %30 = tpu.matmul %23, %26, %cst_22 {dimension_numbers = #tpu.dot_dimension_numbers<[2], [2], [1], [1], [0, 0, 0, 1, 1, 1], [0], [0]>} : vector<4x8x8xf32>, vector<4x8x8xf32>, vector<4x8x8xf32> -> vector<4x8x8xf32>
    "tpu.trace_stop"() : () -> ()
    %31 = vector.shape_cast %1 : vector<8x8xf32> to vector<1x8x8xf32>
    %32 = vector.broadcast %31 : vector<1x8x8xf32> to vector<4x8x8xf32>
    %33 = arith.addf %30, %32 : vector<4x8x8xf32>
    %cst_23 = arith.constant dense<0xFF800000> : vector<4x8xf32>
    %34 = vector.multi_reduction <maximumf>, %33, %cst_23 [2] : vector<4x8x8xf32> to vector<4x8xf32>
    %35 = vector.shape_cast %34 : vector<4x8xf32> to vector<4x8x1xf32>
    %36 = vector.broadcast %35 : vector<4x8x1xf32> to vector<4x8x8xf32>
    %37 = arith.subf %33, %36 : vector<4x8x8xf32>
    %38 = math.exp %37 : vector<4x8x8xf32>
    %cst_24 = arith.constant dense<0.000000e+00> : vector<4x8xf32>
    %39 = vector.multi_reduction <add>, %38, %cst_24 [2] : vector<4x8x8xf32> to vector<4x8xf32>
    %40 = vector.shape_cast %39 : vector<4x8xf32> to vector<4x8x1xf32>
    %41 = tpu.reciprocal %40 {approx = true} : vector<4x8x1xf32> -> vector<4x8x1xf32>
    %42 = vector.broadcast %41 : vector<4x8x1xf32> to vector<4x8x8xf32>
    %43 = arith.mulf %38, %42 : vector<4x8x8xf32>
    "tpu.trace_start"() <{level = 10 : i32, message = "nqk,nkd->nqd"}> : () -> ()
    %cst_25 = arith.constant dense<0.000000e+00> : vector<4x8x8xf32>
    %44 = tpu.matmul %43, %29, %cst_25 {dimension_numbers = #tpu.dot_dimension_numbers<[2], [1], [1], [2], [0, 0, 0, 1, 1, 2], [0], [0]>} : vector<4x8x8xf32>, vector<4x8x8xf32>, vector<4x8x8xf32> -> vector<4x8x8xf32>
    "tpu.trace_stop"() : () -> ()
    %45 = arith.truncf %44 : vector<4x8x8xf32> to vector<4x8x8xbf16>
    %c0_26 = arith.constant 0 : index
    %c0_27 = arith.constant 0 : index
    %c0_28 = arith.constant 0 : index
    %c0_29 = arith.constant 0 : index
    %46 = vector.load %arg6[%c0_26, %c0_27, %c0_28, %c0_29] : memref<2x4x8x32xbf16, #tpu.memory_space<vmem>>, vector<1x4x8x32xbf16>
    %47 = vector.shape_cast %46 : vector<1x4x8x32xbf16> to vector<4x8x32xbf16>
    "tpu.trace_start"() <{level = 10 : i32, message = "nsd,ndh->nsh"}> : () -> ()
    %cst_30 = arith.constant dense<0.000000e+00> : vector<4x8x32xf32>
    %48 = tpu.matmul %45, %47, %cst_30 {dimension_numbers = #tpu.dot_dimension_numbers<[2], [1], [1], [2], [0, 0, 0, 1, 1, 2], [0], [0]>} : vector<4x8x8xbf16>, vector<4x8x32xbf16>, vector<4x8x32xf32> -> vector<4x8x32xf32>
    "tpu.trace_stop"() : () -> ()
    %cst_31 = arith.constant dense<0.000000e+00> : vector<8x32xf32>
    %49 = vector.multi_reduction <add>, %48, %cst_31 [0] : vector<4x8x32xf32> to vector<8x32xf32>
    %50 = arith.addf %0, %49 : vector<8x32xf32>
    %c0_32 = arith.constant 0 : index
    %c0_33 = arith.constant 0 : index
    %51 = vector.load %arg8[%c0_32, %c0_33] : memref<2x32xf32, #tpu.memory_space<vmem>>, vector<1x32xf32>
    %52 = vector.shape_cast %51 : vector<1x32xf32> to vector<32xf32>
    %53 = arith.mulf %50, %50 : vector<8x32xf32>
    %cst_34 = arith.constant dense<0.000000e+00> : vector<8xf32>
    %54 = vector.multi_reduction <add>, %53, %cst_34 [1] : vector<8x32xf32> to vector<8xf32>
    %55 = vector.shape_cast %54 : vector<8xf32> to vector<8x1xf32>
    %cst_35 = arith.constant 3.200000e+01 : f32
    %56 = vector.broadcast %cst_35 : f32 to vector<8x1xf32>
    %57 = arith.divf %55, %56 : vector<8x1xf32>
    %cst_36 = arith.constant 9.99999997E-7 : f32
    %58 = vector.broadcast %cst_36 : f32 to vector<8x1xf32>
    %59 = arith.addf %57, %58 : vector<8x1xf32>
    %60 = math.rsqrt %59 : vector<8x1xf32>
    %61 = vector.broadcast %60 : vector<8x1xf32> to vector<8x32xf32>
    %62 = arith.mulf %50, %61 : vector<8x32xf32>
    %63 = vector.shape_cast %52 : vector<32xf32> to vector<1x32xf32>
    %64 = vector.broadcast %63 : vector<1x32xf32> to vector<8x32xf32>
    %65 = arith.mulf %62, %64 : vector<8x32xf32>
    %66 = arith.truncf %65 : vector<8x32xf32> to vector<8x32xbf16>
    %c0_37 = arith.constant 0 : index
    %c0_38 = arith.constant 0 : index
    %c0_39 = arith.constant 0 : index
    %67 = vector.load %arg9[%c0_37, %c0_38, %c0_39] : memref<2x32x128xbf16, #tpu.memory_space<vmem>>, vector<1x32x128xbf16>
    %68 = vector.shape_cast %67 : vector<1x32x128xbf16> to vector<32x128xbf16>
    %cst_40 = arith.constant dense<0.000000e+00> : vector<8x128xf32>
    %69 = tpu.matmul %66, %68, %cst_40 {dimension_numbers = #tpu.dot_dimension_numbers<[1], [0], [0], [1], [0, 0, 1, 1], [], []>} : vector<8x32xbf16>, vector<32x128xbf16>, vector<8x128xf32> -> vector<8x128xf32>
    %70 = vector.extract_strided_slice %69 {offsets = [0, 0], sizes = [8, 64], strides = [1, 1]} : vector<8x128xf32> to vector<8x64xf32>
    %71 = vector.extract_strided_slice %69 {offsets = [0, 64], sizes = [8, 64], strides = [1, 1]} : vector<8x128xf32> to vector<8x64xf32>
    %72 = arith.negf %70 : vector<8x64xf32>
    %73 = math.exp %72 : vector<8x64xf32>
    %cst_41 = arith.constant 1.000000e+00 : f32
    %74 = vector.broadcast %cst_41 : f32 to vector<8x64xf32>
    %75 = arith.addf %74, %73 : vector<8x64xf32>
    %76 = arith.divf %74, %75 : vector<8x64xf32>
    %77 = arith.mulf %70, %76 : vector<8x64xf32>
    %78 = arith.mulf %77, %71 : vector<8x64xf32>
    %79 = arith.truncf %78 : vector<8x64xf32> to vector<8x64xbf16>
    %c0_42 = arith.constant 0 : index
    %c0_43 = arith.constant 0 : index
    %c0_44 = arith.constant 0 : index
    %80 = vector.load %arg10[%c0_42, %c0_43, %c0_44] : memref<2x64x32xbf16, #tpu.memory_space<vmem>>, vector<1x64x32xbf16>
    %81 = vector.shape_cast %80 : vector<1x64x32xbf16> to vector<64x32xbf16>
    %cst_45 = arith.constant dense<0.000000e+00> : vector<8x32xf32>
    %82 = tpu.matmul %79, %81, %cst_45 {dimension_numbers = #tpu.dot_dimension_numbers<[1], [0], [0], [1], [0, 0, 1, 1], [], []>} : vector<8x64xbf16>, vector<64x32xbf16>, vector<8x32xf32> -> vector<8x32xf32>
    %83 = arith.addf %50, %82 : vector<8x32xf32>
    %c1 = arith.constant 1 : index
    %c0_46 = arith.constant 0 : index
    %84 = vector.load %arg7[%c1, %c0_46] : memref<2x32xf32, #tpu.memory_space<vmem>>, vector<1x32xf32>
    %85 = vector.shape_cast %84 : vector<1x32xf32> to vector<32xf32>
    %86 = arith.mulf %83, %83 : vector<8x32xf32>
    %cst_47 = arith.constant dense<0.000000e+00> : vector<8xf32>
    %87 = vector.multi_reduction <add>, %86, %cst_47 [1] : vector<8x32xf32> to vector<8xf32>
    %88 = vector.shape_cast %87 : vector<8xf32> to vector<8x1xf32>
    %cst_48 = arith.constant 3.200000e+01 : f32
    %89 = vector.broadcast %cst_48 : f32 to vector<8x1xf32>
    %90 = arith.divf %88, %89 : vector<8x1xf32>
    %cst_49 = arith.constant 9.99999997E-7 : f32
    %91 = vector.broadcast %cst_49 : f32 to vector<8x1xf32>
    %92 = arith.addf %90, %91 : vector<8x1xf32>
    %93 = math.rsqrt %92 : vector<8x1xf32>
    %94 = vector.broadcast %93 : vector<8x1xf32> to vector<8x32xf32>
    %95 = arith.mulf %83, %94 : vector<8x32xf32>
    %96 = vector.shape_cast %85 : vector<32xf32> to vector<1x32xf32>
    %97 = vector.broadcast %96 : vector<1x32xf32> to vector<8x32xf32>
    %98 = arith.mulf %95, %97 : vector<8x32xf32>
    %99 = arith.truncf %98 : vector<8x32xf32> to vector<8x32xbf16>
    %100 = vector.shape_cast %99 : vector<8x32xbf16> to vector<1x8x32xbf16>
    %101 = vector.shape_cast %100 : vector<1x8x32xbf16> to vector<1x8x32xbf16>
    %102 = vector.broadcast %101 : vector<1x8x32xbf16> to vector<4x8x32xbf16>
    %c1_50 = arith.constant 1 : index
    %c0_51 = arith.constant 0 : index
    %c0_52 = arith.constant 0 : index
    %c0_53 = arith.constant 0 : index
    %103 = vector.load %arg3[%c1_50, %c0_51, %c0_52, %c0_53] : memref<2x4x32x8xbf16, #tpu.memory_space<vmem>>, vector<1x4x32x8xbf16>
    %104 = vector.shape_cast %103 : vector<1x4x32x8xbf16> to vector<4x32x8xbf16>
    "tpu.trace_start"() <{level = 10 : i32, message = "nsh,nhd->nsd"}> : () -> ()
    %cst_54 = arith.constant dense<0.000000e+00> : vector<4x8x8xf32>
    %105 = tpu.matmul %102, %104, %cst_54 {dimension_numbers = #tpu.dot_dimension_numbers<[2], [1], [1], [2], [0, 0, 0, 1, 1, 2], [0], [0]>} : vector<4x8x32xbf16>, vector<4x32x8xbf16>, vector<4x8x8xf32> -> vector<4x8x8xf32>
    "tpu.trace_stop"() : () -> ()
    %c1_55 = arith.constant 1 : index
    %c0_56 = arith.constant 0 : index
    %c0_57 = arith.constant 0 : index
    %c0_58 = arith.constant 0 : index
    %106 = vector.load %arg4[%c1_55, %c0_56, %c0_57, %c0_58] : memref<2x4x32x8xbf16, #tpu.memory_space<vmem>>, vector<1x4x32x8xbf16>
    %107 = vector.shape_cast %106 : vector<1x4x32x8xbf16> to vector<4x32x8xbf16>
    "tpu.trace_start"() <{level = 10 : i32, message = "nsh,nhd->nsd"}> : () -> ()
    %cst_59 = arith.constant dense<0.000000e+00> : vector<4x8x8xf32>
    %108 = tpu.matmul %102, %107, %cst_59 {dimension_numbers = #tpu.dot_dimension_numbers<[2], [1], [1], [2], [0, 0, 0, 1, 1, 2], [0], [0]>} : vector<4x8x32xbf16>, vector<4x32x8xbf16>, vector<4x8x8xf32> -> vector<4x8x8xf32>
    "tpu.trace_stop"() : () -> ()
    %c1_60 = arith.constant 1 : index
    %c0_61 = arith.constant 0 : index
    %c0_62 = arith.constant 0 : index
    %c0_63 = arith.constant 0 : index
    %109 = vector.load %arg5[%c1_60, %c0_61, %c0_62, %c0_63] : memref<2x4x32x8xbf16, #tpu.memory_space<vmem>>, vector<1x4x32x8xbf16>
    %110 = vector.shape_cast %109 : vector<1x4x32x8xbf16> to vector<4x32x8xbf16>
    "tpu.trace_start"() <{level = 10 : i32, message = "nsh,nhd->nsd"}> : () -> ()
    %cst_64 = arith.constant dense<0.000000e+00> : vector<4x8x8xf32>
    %111 = tpu.matmul %102, %110, %cst_64 {dimension_numbers = #tpu.dot_dimension_numbers<[2], [1], [1], [2], [0, 0, 0, 1, 1, 2], [0], [0]>} : vector<4x8x32xbf16>, vector<4x32x8xbf16>, vector<4x8x8xf32> -> vector<4x8x8xf32>
    "tpu.trace_stop"() : () -> ()
    "tpu.trace_start"() <{level = 10 : i32, message = "nqd,nkd->nqk"}> : () -> ()
    %cst_65 = arith.constant dense<0.000000e+00> : vector<4x8x8xf32>
    %112 = tpu.matmul %105, %108, %cst_65 {dimension_numbers = #tpu.dot_dimension_numbers<[2], [2], [1], [1], [0, 0, 0, 1, 1, 1], [0], [0]>} : vector<4x8x8xf32>, vector<4x8x8xf32>, vector<4x8x8xf32> -> vector<4x8x8xf32>
    "tpu.trace_stop"() : () -> ()
    %113 = vector.shape_cast %1 : vector<8x8xf32> to vector<1x8x8xf32>
    %114 = vector.broadcast %113 : vector<1x8x8xf32> to vector<4x8x8xf32>
    %115 = arith.addf %112, %114 : vector<4x8x8xf32>
    %cst_66 = arith.constant dense<0xFF800000> : vector<4x8xf32>
    %116 = vector.multi_reduction <maximumf>, %115, %cst_66 [2] : vector<4x8x8xf32> to vector<4x8xf32>
    %117 = vector.shape_cast %116 : vector<4x8xf32> to vector<4x8x1xf32>
    %118 = vector.broadcast %117 : vector<4x8x1xf32> to vector<4x8x8xf32>
    %119 = arith.subf %115, %118 : vector<4x8x8xf32>
    %120 = math.exp %119 : vector<4x8x8xf32>
    %cst_67 = arith.constant dense<0.000000e+00> : vector<4x8xf32>
    %121 = vector.multi_reduction <add>, %120, %cst_67 [2] : vector<4x8x8xf32> to vector<4x8xf32>
    %122 = vector.shape_cast %121 : vector<4x8xf32> to vector<4x8x1xf32>
    %123 = tpu.reciprocal %122 {approx = true} : vector<4x8x1xf32> -> vector<4x8x1xf32>
    %124 = vector.broadcast %123 : vector<4x8x1xf32> to vector<4x8x8xf32>
    %125 = arith.mulf %120, %124 : vector<4x8x8xf32>
    "tpu.trace_start"() <{level = 10 : i32, message = "nqk,nkd->nqd"}> : () -> ()
    %cst_68 = arith.constant dense<0.000000e+00> : vector<4x8x8xf32>
    %126 = tpu.matmul %125, %111, %cst_68 {dimension_numbers = #tpu.dot_dimension_numbers<[2], [1], [1], [2], [0, 0, 0, 1, 1, 2], [0], [0]>} : vector<4x8x8xf32>, vector<4x8x8xf32>, vector<4x8x8xf32> -> vector<4x8x8xf32>
    "tpu.trace_stop"() : () -> ()
    %127 = arith.truncf %126 : vector<4x8x8xf32> to vector<4x8x8xbf16>
    %c1_69 = arith.constant 1 : index
    %c0_70 = arith.constant 0 : index
    %c0_71 = arith.constant 0 : index
    %c0_72 = arith.constant 0 : index
    %128 = vector.load %arg6[%c1_69, %c0_70, %c0_71, %c0_72] : memref<2x4x8x32xbf16, #tpu.memory_space<vmem>>, vector<1x4x8x32xbf16>
    %129 = vector.shape_cast %128 : vector<1x4x8x32xbf16> to vector<4x8x32xbf16>
    "tpu.trace_start"() <{level = 10 : i32, message = "nsd,ndh->nsh"}> : () -> ()
    %cst_73 = arith.constant dense<0.000000e+00> : vector<4x8x32xf32>
    %130 = tpu.matmul %127, %129, %cst_73 {dimension_numbers = #tpu.dot_dimension_numbers<[2], [1], [1], [2], [0, 0, 0, 1, 1, 2], [0], [0]>} : vector<4x8x8xbf16>, vector<4x8x32xbf16>, vector<4x8x32xf32> -> vector<4x8x32xf32>
    "tpu.trace_stop"() : () -> ()
    %cst_74 = arith.constant dense<0.000000e+00> : vector<8x32xf32>
    %131 = vector.multi_reduction <add>, %130, %cst_74 [0] : vector<4x8x32xf32> to vector<8x32xf32>
    %132 = arith.addf %83, %131 : vector<8x32xf32>
    %c1_75 = arith.constant 1 : index
    %c0_76 = arith.constant 0 : index
    %133 = vector.load %arg8[%c1_75, %c0_76] : memref<2x32xf32, #tpu.memory_space<vmem>>, vector<1x32xf32>
    %134 = vector.shape_cast %133 : vector<1x32xf32> to vector<32xf32>
    %135 = arith.mulf %132, %132 : vector<8x32xf32>
    %cst_77 = arith.constant dense<0.000000e+00> : vector<8xf32>
    %136 = vector.multi_reduction <add>, %135, %cst_77 [1] : vector<8x32xf32> to vector<8xf32>
    %137 = vector.shape_cast %136 : vector<8xf32> to vector<8x1xf32>
    %cst_78 = arith.constant 3.200000e+01 : f32
    %138 = vector.broadcast %cst_78 : f32 to vector<8x1xf32>
    %139 = arith.divf %137, %138 : vector<8x1xf32>
    %cst_79 = arith.constant 9.99999997E-7 : f32
    %140 = vector.broadcast %cst_79 : f32 to vector<8x1xf32>
    %141 = arith.addf %139, %140 : vector<8x1xf32>
    %142 = math.rsqrt %141 : vector<8x1xf32>
    %143 = vector.broadcast %142 : vector<8x1xf32> to vector<8x32xf32>
    %144 = arith.mulf %132, %143 : vector<8x32xf32>
    %145 = vector.shape_cast %134 : vector<32xf32> to vector<1x32xf32>
    %146 = vector.broadcast %145 : vector<1x32xf32> to vector<8x32xf32>
    %147 = arith.mulf %144, %146 : vector<8x32xf32>
    %148 = arith.truncf %147 : vector<8x32xf32> to vector<8x32xbf16>
    %c1_80 = arith.constant 1 : index
    %c0_81 = arith.constant 0 : index
    %c0_82 = arith.constant 0 : index
    %149 = vector.load %arg9[%c1_80, %c0_81, %c0_82] : memref<2x32x128xbf16, #tpu.memory_space<vmem>>, vector<1x32x128xbf16>
    %150 = vector.shape_cast %149 : vector<1x32x128xbf16> to vector<32x128xbf16>
    %cst_83 = arith.constant dense<0.000000e+00> : vector<8x128xf32>
    %151 = tpu.matmul %148, %150, %cst_83 {dimension_numbers = #tpu.dot_dimension_numbers<[1], [0], [0], [1], [0, 0, 1, 1], [], []>} : vector<8x32xbf16>, vector<32x128xbf16>, vector<8x128xf32> -> vector<8x128xf32>
    %152 = vector.extract_strided_slice %151 {offsets = [0, 0], sizes = [8, 64], strides = [1, 1]} : vector<8x128xf32> to vector<8x64xf32>
    %153 = vector.extract_strided_slice %151 {offsets = [0, 64], sizes = [8, 64], strides = [1, 1]} : vector<8x128xf32> to vector<8x64xf32>
    %154 = arith.negf %152 : vector<8x64xf32>
    %155 = math.exp %154 : vector<8x64xf32>
    %cst_84 = arith.constant 1.000000e+00 : f32
    %156 = vector.broadcast %cst_84 : f32 to vector<8x64xf32>
    %157 = arith.addf %156, %155 : vector<8x64xf32>
    %158 = arith.divf %156, %157 : vector<8x64xf32>
    %159 = arith.mulf %152, %158 : vector<8x64xf32>
    %160 = arith.mulf %159, %153 : vector<8x64xf32>
    %161 = arith.truncf %160 : vector<8x64xf32> to vector<8x64xbf16>
    %c1_85 = arith.constant 1 : index
    %c0_86 = arith.constant 0 : index
    %c0_87 = arith.constant 0 : index
    %162 = vector.load %arg10[%c1_85, %c0_86, %c0_87] : memref<2x64x32xbf16, #tpu.memory_space<vmem>>, vector<1x64x32xbf16>
    %163 = vector.shape_cast %162 : vector<1x64x32xbf16> to vector<64x32xbf16>
    %cst_88 = arith.constant dense<0.000000e+00> : vector<8x32xf32>
    %164 = tpu.matmul %161, %163, %cst_88 {dimension_numbers = #tpu.dot_dimension_numbers<[1], [0], [0], [1], [0, 0, 1, 1], [], []>} : vector<8x64xbf16>, vector<64x32xbf16>, vector<8x32xf32> -> vector<8x32xf32>
    %165 = arith.addf %132, %164 : vector<8x32xf32>
    %c0_89 = arith.constant 0 : index
    %c0_90 = arith.constant 0 : index
    %166 = vector.load %arg11[%c0_89, %c0_90] : memref<1x32xf32, #tpu.memory_space<vmem>>, vector<1x32xf32>
    %167 = vector.shape_cast %166 : vector<1x32xf32> to vector<32xf32>
    %168 = arith.mulf %165, %165 : vector<8x32xf32>
    %cst_91 = arith.constant dense<0.000000e+00> : vector<8xf32>
    %169 = vector.multi_reduction <add>, %168, %cst_91 [1] : vector<8x32xf32> to vector<8xf32>
    %170 = vector.shape_cast %169 : vector<8xf32> to vector<8x1xf32>
    %cst_92 = arith.constant 3.200000e+01 : f32
    %171 = vector.broadcast %cst_92 : f32 to vector<8x1xf32>
    %172 = arith.divf %170, %171 : vector<8x1xf32>
    %cst_93 = arith.constant 9.99999997E-7 : f32
    %173 = vector.broadcast %cst_93 : f32 to vector<8x1xf32>
    %174 = arith.addf %172, %173 : vector<8x1xf32>
    %175 = math.rsqrt %174 : vector<8x1xf32>
    %176 = vector.broadcast %175 : vector<8x1xf32> to vector<8x32xf32>
    %177 = arith.mulf %165, %176 : vector<8x32xf32>
    %178 = vector.shape_cast %167 : vector<32xf32> to vector<1x32xf32>
    %179 = vector.broadcast %178 : vector<1x32xf32> to vector<8x32xf32>
    %180 = arith.mulf %177, %179 : vector<8x32xf32>
    %181 = arith.truncf %180 : vector<8x32xf32> to vector<8x32xbf16>
    %c0_94 = arith.constant 0 : index
    %c0_95 = arith.constant 0 : index
    %182 = vector.load %arg12[%c0_94, %c0_95] : memref<32x128xbf16, #tpu.memory_space<vmem>>, vector<32x128xbf16>
    %cst_96 = arith.constant dense<0.000000e+00> : vector<8x128xf32>
    %183 = tpu.matmul %181, %182, %cst_96 {dimension_numbers = #tpu.dot_dimension_numbers<[1], [0], [0], [1], [0, 0, 1, 1], [], []>} : vector<8x32xbf16>, vector<32x128xbf16>, vector<8x128xf32> -> vector<8x128xf32>
    %c0_97 = arith.constant 0 : index
    %c0_98 = arith.constant 0 : index
    %184 = vector.load %arg13[%c0_97, %c0_98] : memref<1x128xf32, #tpu.memory_space<vmem>>, vector<1x128xf32>
    %185 = vector.broadcast %184 : vector<1x128xf32> to vector<8x128xf32>
    %186 = arith.addf %183, %185 : vector<8x128xf32>
    %c0_99 = arith.constant 0 : index
    %c0_100 = arith.constant 0 : index
    %187 = vector.load %arg14[%c0_99, %c0_100] : memref<8x128xf32, #tpu.memory_space<vmem>>, vector<8x128xf32>
    tpu.vector_store %arg14[%c0_99, %c0_100], %186 {strides = array<i32>} : memref<8x128xf32, #tpu.memory_space<vmem>>, vector<8x128xf32>,
    return
  }
  func.func @transform_0(%arg0: i32) -> (i32, i32) {
    %c0_i32 = arith.constant 0 : i32
    %c0_i32_0 = arith.constant 0 : i32
    return %arg0, %c0_i32 : i32, i32
  }
  func.func @transform_1(%arg0: i32) -> (i32, i32) {
    %c0_i32 = arith.constant 0 : i32
    %c0_i32_0 = arith.constant 0 : i32
    %c0_i32_1 = arith.constant 0 : i32
    return %c0_i32, %c0_i32_0 : i32, i32
  }
  func.func @transform_2(%arg0: i32) -> (i32, i32, i32, i32) {
    %c0_i32 = arith.constant 0 : i32
    %c0_i32_0 = arith.constant 0 : i32
    %c0_i32_1 = arith.constant 0 : i32
    %c0_i32_2 = arith.constant 0 : i32
    %c0_i32_3 = arith.constant 0 : i32
    return %c0_i32, %c0_i32_0, %c0_i32_1, %c0_i32_2 : i32, i32, i32, i32
  }
  func.func @transform_3(%arg0: i32) -> (i32, i32, i32, i32) {
    %c0_i32 = arith.constant 0 : i32
    %c0_i32_0 = arith.constant 0 : i32
    %c0_i32_1 = arith.constant 0 : i32
    %c0_i32_2 = arith.constant 0 : i32
    %c0_i32_3 = arith.constant 0 : i32
    return %c0_i32, %c0_i32_0, %c0_i32_1, %c0_i32_2 : i32, i32, i32, i32
  }
  func.func @transform_4(%arg0: i32) -> (i32, i32, i32, i32) {
    %c0_i32 = arith.constant 0 : i32
    %c0_i32_0 = arith.constant 0 : i32
    %c0_i32_1 = arith.constant 0 : i32
    %c0_i32_2 = arith.constant 0 : i32
    %c0_i32_3 = arith.constant 0 : i32
    return %c0_i32, %c0_i32_0, %c0_i32_1, %c0_i32_2 : i32, i32, i32, i32
  }
  func.func @transform_5(%arg0: i32) -> (i32, i32, i32, i32) {
    %c0_i32 = arith.constant 0 : i32
    %c0_i32_0 = arith.constant 0 : i32
    %c0_i32_1 = arith.constant 0 : i32
    %c0_i32_2 = arith.constant 0 : i32
    %c0_i32_3 = arith.constant 0 : i32
    return %c0_i32, %c0_i32_0, %c0_i32_1, %c0_i32_2 : i32, i32, i32, i32
  }
  func.func @transform_6(%arg0: i32) -> (i32, i32) {
    %c0_i32 = arith.constant 0 : i32
    %c0_i32_0 = arith.constant 0 : i32
    %c0_i32_1 = arith.constant 0 : i32
    return %c0_i32, %c0_i32_0 : i32, i32
  }
  func.func @transform_7(%arg0: i32) -> (i32, i32) {
    %c0_i32 = arith.constant 0 : i32
    %c0_i32_0 = arith.constant 0 : i32
    %c0_i32_1 = arith.constant 0 : i32
    return %c0_i32, %c0_i32_0 : i32, i32
  }
  func.func @transform_8(%arg0: i32) -> (i32, i32, i32) {
    %c0_i32 = arith.constant 0 : i32
    %c0_i32_0 = arith.constant 0 : i32
    %c0_i32_1 = arith.constant 0 : i32
    %c0_i32_2 = arith.constant 0 : i32
    return %c0_i32, %c0_i32_0, %c0_i32_1 : i32, i32, i32
  }
  func.func @transform_9(%arg0: i32) -> (i32, i32, i32) {
    %c0_i32 = arith.constant 0 : i32
    %c0_i32_0 = arith.constant 0 : i32
    %c0_i32_1 = arith.constant 0 : i32
    %c0_i32_2 = arith.constant 0 : i32
    return %c0_i32, %c0_i32_0, %c0_i32_1 : i32, i32, i32
  }
  func.func @transform_10(%arg0: i32) -> (i32, i32) {
    %c0_i32 = arith.constant 0 : i32
    %c0_i32_0 = arith.constant 0 : i32
    %c0_i32_1 = arith.constant 0 : i32
    return %c0_i32, %c0_i32_0 : i32, i32
  }
  func.func @transform_11(%arg0: i32) -> (i32, i32) {
    %c0_i32 = arith.constant 0 : i32
    %c0_i32_0 = arith.constant 0 : i32
    %c0_i32_1 = arith.constant 0 : i32
    return %c0_i32, %c0_i32_0 : i32, i32
  }
  func.func @transform_12(%arg0: i32) -> (i32, i32) {
    %c0_i32 = arith.constant 0 : i32
    %c0_i32_0 = arith.constant 0 : i32
    %c0_i32_1 = arith.constant 0 : i32
    return %c0_i32, %c0_i32_0 : i32, i32
  }
  func.func @transform_13(%arg0: i32) -> (i32, i32) {
    %c0_i32 = arith.constant 0 : i32
    %c0_i32_0 = arith.constant 0 : i32
    return %arg0, %c0_i32 : i32, i32
  }
}

</mosaic_0001>

<bundles_post_ra>
// kernel: deepseek_forward.1
= control target key start
LH: loop header
LB: loop body
LE: loop exit
PB: predicated region body
PF: predicated region fallthrough
CT: control target
= control target key end

     0   :  { %s2827_s25 = smov 0   ;;  %s3223_s0 = inlined_call_operand.vmem [shape: f32[16,32], index: 0, kind: input, shape index: {}]   ;;  %s3224_s1 = inlined_call_operand.vmem [shape: f32[8,8], index: 1, kind: input, shape index: {}]   ;;  %s3225_s2 = inlined_call_operand.vmem [shape: bf16[2,4,32,8], index: 2, kind: input, shape index: {}]   ;;  %s3226_s3 = inlined_call_operand.vmem [shape: bf16[2,4,32,8], index: 3, kind: input, shape index: {}]   ;;  %s3227_s4 = inlined_call_operand.vmem [shape: bf16[2,4,32,8], index: 4, kind: input, shape index: {}]   ;;  %s3228_s5 = inlined_call_operand.vmem [shape: bf16[2,4,8,32], index: 5, kind: input, shape index: {}]   ;;  %s3229_s6 = inlined_call_operand.vmem [shape: f32[2,32], index: 6, kind: input, shape index: {}]   ;;  %s3230_s7 = inlined_call_operand.vmem [shape: f32[2,32], index: 7, kind: input, shape index: {}]   ;;  %s3231_s8 = inlined_call_operand.vmem [shape: bf16[2,32,128], index: 8, kind: input, shape index: {}]   ;;  %s3232_s9 = inlined_call_operand.vmem [shape: bf16[2,64,32], index: 9, kind: input, shape index: {}]   ;;  %s3233_s10 = inlined_call_operand.vmem [shape: f32[1,32], index: 10, kind: input, shape index: {}]   ;;  %s3234_s11 = inlined_call_operand.vmem [shape: bf16[32,128], index: 11, kind: input, shape index: {}]   ;;  %s3235_s12 = inlined_call_operand.vmem [shape: f32[1,128], index: 12, kind: input, shape index: {}]   ;;  %s3236_s13 = inlined_call_operand.vmem [shape: f32[16,128], index: 13, kind: output, shape index: {}]  }
   0x1 LB: > { %s2233_s26 = sadd.s32 4294967295, %s2753_s25   ;;  %p2237_p0 = scmp.ge.s32.totalorder %s2753_s25, 1  ;;  %s2753_s25 = sphi %s2827_s25, %s23_s25  }
   0x2   : > { %p386_p1 = scmp.lt.s32.totalorder %s2753_s25, 3 }
   0x4   : > { %p387_p2 = pnand %p2237_p0, %p386_p1 }
   0x5   : > { %p428_p3 = scmp.lt.s32.totalorder (!%p387_p2), %s2233_s26, 1  ;;  %s2756_s16 = smov (!%p387_p2), 64  }
   0x6   : > { %390 = sbr.rel (%p387_p2) target bundleno = 3271 (0xcc7), region = 72 }
   0xb   : > { %s3238_s26 = smov (!%p428_p3, %s2233_s26), 1  ;;  %vm441_vm0 = vcmask 261120   ;;  %v2755_v3 = vmov 32.0   ;;  %v2618_v7 = vld [vmem:[%s3225_s2 + $0x8] sm:$0xff]  ;;  %v2620_v8 = vld [vmem:[%s3225_s2 + $0x18] sm:$0xff]  ;;  %v2617_v12 = vld [vmem:[%s3225_s2] sm:$0xff] }
   0xc   : > { %s2238_s27 = sshll.u32 %s3238_s26, 3  ;;  %2695 = vrcp.f32 %v2755_v3  ;;  %v2622_v9 = vld [vmem:[%s3225_s2 + $0x28] sm:$0xff]  ;;  %v2624_v10 = vld [vmem:[%s3225_s2 + $0x38] sm:$0xff]  ;;  %505 = vmatpush.bf16.msra.mxu0 %v2618_v7  ;;  %530 = vmatpush.bf16.msra.mxu1 %v2620_v8  ;;  %v2619_v13 = vld [vmem:[%s3225_s2 + $0x10] sm:$0xff]  ;;  %vm819_vm5 = vcmask 64512   ;;  %vm1071_vm6 = vcmask 1043456  }
   0xd   : > { %s431_s30 = scalar_lea.vmem %s3223_s0, %s2238_s27  ;;  %555 = vmatpush.bf16.msra.mxu2 %v2622_v9  ;;  %580 = vmatpush.bf16.msra.mxu3 %v2624_v10  ;;  %v2621_v14 = vld [vmem:[%s3225_s2 + $0x20] sm:$0xff]  ;;  %v2623_v15 = vld [vmem:[%s3225_s2 + $0x30] sm:$0xff]  ;;  %v2626_v18 = vld [vmem:[%s3226_s3 + $0x8] sm:$0xff]  ;;  %vm1264_vm14 = vcmask 523264   ;;  %s435_s22 = scalar_lea.vmem %s3236_s13, %s2238_s27 }
   0xe   : > { %v2843_v0 = vld [vmem:[%s431_s30] sm:$0xff]  ;;  %v2628_v19 = vld [vmem:[%s3226_s3 + $0x18] sm:$0xff]  ;;  %v2630_v20 = vld [vmem:[%s3226_s3 + $0x28] sm:$0xff] }
   0xf   : > { %v440_v1 = vmul.f32 %v2843_v0, %v2843_v0  ;;  %v2632_v21 = vld [vmem:[%s3226_s3 + $0x38] sm:$0xff]  ;;  %v2625_v23 = vld [vmem:[%s3226_s3] sm:$0xff]  ;;  %v2627_v24 = vld [vmem:[%s3226_s3 + $0x10] sm:$0xff] }
  0x10   : > { %506 = vmatpush.bf16.msra.mxu0 %v2617_v12  ;;  %531 = vmatpush.bf16.msra.mxu1 %v2619_v13  ;;  %v2629_v26 = vld [vmem:[%s3226_s3 + $0x20] sm:$0xff]  ;;  %v2631_v27 = vld [vmem:[%s3226_s3 + $0x30] sm:$0xff]  ;;  %v2634_v40 = vld [vmem:[%s3227_s4 + $0x8] sm:$0xff] }
  0x11   : > { %v442_v2 = vsel %vm441_vm0, %v440_v1, 0.0  ;;  %556 = vmatpush.bf16.msra.mxu2 %v2621_v14  ;;  %581 = vmatpush.bf16.msra.mxu3 %v2623_v15  ;;  %v2689_v35 = vld [vmem:[%s3229_s6] ss:$0 sm:$0xff]  ;;  %v2636_v41 = vld [vmem:[%s3227_s4 + $0x18] sm:$0xff]  ;;  %v2638_v42 = vld [vmem:[%s3227_s4 + $0x28] sm:$0xff] }
  0x12   : > { %443 = vadd.xlane.f32.xlu0 %v442_v2  ;;  %v2696_v4 = vpop.eup %2695  ;;  %v2640_v43 = vld [vmem:[%s3227_s4 + $0x38] sm:$0xff]  ;;  %v2633_v44 = vld [vmem:[%s3227_s4] sm:$0xff]  ;;  %v2635_v45 = vld [vmem:[%s3227_s4 + $0x10] sm:$0xff] }
  0x13   : > { %v446_v5 = vmul.f32 32.0, %v2696_v4  ;;  %vm450_vm1 = vweird.f32 %v2696_v4  ;;  %v2637_v46 = vld [vmem:[%s3227_s4 + $0x20] sm:$0xff]  ;;  %v2639_v47 = vld [vmem:[%s3227_s4 + $0x30] sm:$0xff] }
  0x14   : > { %621 = vmatpush.bf16.msrb.mxu0 %v2626_v18  ;;  %646 = vmatpush.bf16.msrb.mxu1 %v2628_v19  ;;  %v2950_v9 = vld [vmem:[%s3224_s1] sm:$0xff] }
  0x15   : > { %v447_v6 = vsub.f32 1.0, %v446_v5  ;;  %671 = vmatpush.bf16.msrb.mxu2 %v2630_v20  ;;  %696 = vmatpush.bf16.msrb.mxu3 %v2632_v21 }
  0x17   : > { %v448_v11 = vmul.f32 %v2696_v4, %v447_v6 }
  0x18   : > { %622 = vmatpush.bf16.msrb.mxu0 %v2625_v23  ;;  %647 = vmatpush.bf16.msrb.mxu1 %v2627_v24 }
  0x19   : > { %v449_v16 = vadd.f32 %v2696_v4, %v448_v11  ;;  %672 = vmatpush.bf16.msrb.mxu2 %v2629_v26  ;;  %697 = vmatpush.bf16.msrb.mxu3 %v2631_v27 }
  0x1b   : > { %v2872_v17 = vsel %vm450_vm1, %v2696_v4, %v449_v16 }
  0x85   : > { %v444_v22 = vpop.xlane.xlu0 %443 }
  0x86   : > { %v452_v25 = vmul.f32 %v2872_v17, %v444_v22 }
  0x88   : > { %v453_v28 = vadd.f32 1e-06, %v452_v25 }
  0x8a   : > { %2697 = vrsqrt.f32 %v453_v28  ;;  %vm460_vm3 = vweird.f32 %v453_v28 }
  0x90   : > { %v2698_v29 = vpop.eup %2697 }
  0x91   : > { %v455_v30 = vmul.f32 %v2698_v29, %v453_v28  ;;  %vm461_vm2 = vweird.f32 %v2698_v29 }
  0x92   : > { %vm462_vm4 = vmor %vm460_vm3, %vm461_vm2 }
  0x93   : > { %v456_v31 = vmul.f32 %v2698_v29, %v455_v30 }
  0x95   : > { %v457_v32 = vmul.f32 0.5, %v456_v31 }
  0x97   : > { %v458_v33 = vsub.f32 1.5, %v457_v32 }
  0x99   : > { %v459_v34 = vmul.f32 %v2698_v29, %v458_v33 }
  0x9b   : > { %v463_v36 = vsel %vm462_vm4, %v2698_v29, %v459_v34 }
  0x9c   : > { %v464_v37 = vmul.f32 %v463_v36, %v2843_v0 }
  0x9e   : > { %v466_v38 = vmul.f32 %v2689_v35, %v464_v37 }
  0xa0   : > { %v467_v39 = vpack.c.bf16 %v466_v38, %v466_v38 }
  0xa2   : > { %2248 = vmatmul.msk.bf16.vlgmr.msra.gmra.mxu0 %vm441_vm0, %v467_v39  ;;  %2257 = vmatmul.msk.bf16.vlgmr.msra.gmra.mxu1 %vm441_vm0, %v467_v39 }
  0xa3   : > { %2266 = vmatmul.msk.bf16.vlgmr.msra.gmra.mxu2 %vm441_vm0, %v467_v39  ;;  %2275 = vmatmul.msk.bf16.vlgmr.msra.gmra.mxu3 %vm441_vm0, %v467_v39 }
  0xa4   : > { %737 = vmatpush.bf16.msra.mxu0 %v2634_v40  ;;  %762 = vmatpush.bf16.msra.mxu1 %v2636_v41 }
  0xa5   : > { %787 = vmatpush.bf16.msra.mxu2 %v2638_v42  ;;  %812 = vmatpush.bf16.msra.mxu3 %v2640_v43 }
  0xa8   : > { %738 = vmatpush.bf16.msra.mxu0 %v2633_v44  ;;  %763 = vmatpush.bf16.msra.mxu1 %v2635_v45 }
  0xa9   : > { %788 = vmatpush.bf16.msra.mxu2 %v2637_v46  ;;  %813 = vmatpush.bf16.msra.mxu3 %v2639_v47 }
  0xb2   : > { %2284 = vmatmul.msk.bf16.vlgmr.msrb.gmra.mxu0 %vm441_vm0, %v467_v39  ;;  %2293 = vmatmul.msk.bf16.vlgmr.msrb.gmra.mxu1 %vm441_vm0, %v467_v39 }
  0xb3   : > { %2302 = vmatmul.msk.bf16.vlgmr.msrb.gmra.mxu2 %vm441_vm0, %v467_v39  ;;  %2311 = vmatmul.msk.bf16.vlgmr.msrb.gmra.mxu3 %vm441_vm0, %v467_v39 }
  0xc2   : > { %2320 = vmatmul.msk.bf16.vlgmr.msra.gmra.mxu0 %vm441_vm0, %v467_v39  ;;  %2329 = vmatmul.msk.bf16.vlgmr.msra.gmra.mxu1 %vm441_vm0, %v467_v39 }
  0xc3   : > { %2338 = vmatmul.msk.bf16.vlgmr.msra.gmra.mxu2 %vm441_vm0, %v467_v39  ;;  %2347 = vmatmul.msk.bf16.vlgmr.msra.gmra.mxu3 %vm441_vm0, %v467_v39 }
 0x11f   : > { %v508_v48 = vpop.f32.mrf.mxu0  ;;  %v533_v49 = vpop.f32.mrf.mxu1 }
 0x126   : > { %v558_v50 = vpop.f32.mrf.mxu2  ;;  %v583_v51 = vpop.f32.mrf.mxu3 }
 0x127   : > { %v510_v52 = vpop.f32.mrf.mxu0  ;;  %v535_v53 = vpop.f32.mrf.mxu1 }
 0x12e   : > { %v560_v54 = vpop.f32.mrf.mxu2  ;;  %v585_v55 = vpop.f32.mrf.mxu3 }
 0x12f   : > { %v624_v56 = vpop.f32.mrf.mxu0  ;;  %v649_v57 = vpop.f32.mrf.mxu1  ;;  %v1066_v55 = vld [vmem:[%s3228_s5 + $0x8] sm:$0xf] }
 0x130   : > { %2348 = vmatpush.xpose.msk.msrb.mxu3 %vm819_vm5, %v624_v56  ;;  %2350 = vmatpush.xpose.msk.msrb.mxu1 %vm819_vm5, %v649_v57  ;;  %v1111_v56 = vsel %vm1071_vm6, %v1066_v55, 0  ;;  %v1065_v57 = vld [vmem:[%s3228_s5 + $0x4] sm:$0xf] }
 0x133   : > { %2349 = vmatmul.msk.f32.vlgmr.msrb.gmra.mxu3 %vm819_vm5, %v508_v48  ;;  %2351 = vmatmul.msk.f32.vlgmr.msrb.gmra.mxu1 %vm819_vm5, %v533_v49 }
 0x136   : > { %v674_v58 = vpop.f32.mrf.mxu2  ;;  %v699_v59 = vpop.f32.mrf.mxu3 }
 0x137   : > { %2352 = vmatpush.xpose.msk.msrb.mxu2 %vm819_vm5, %v674_v58  ;;  %2354 = vmatpush.xpose.msk.msra.mxu3 %vm819_vm5, %v699_v59  ;;  %v626_v60 = vpop.f32.mrf.mxu0  ;;  %v651_v61 = vpop.f32.mrf.mxu1  ;;  %v1067_v58 = vld [vmem:[%s3228_s5 + $0xc] sm:$0xf]  ;;  %v1092_v59 = vsel %vm1071_vm6, %v1065_v57, 0 }
 0x138   : > { %v1130_v60 = vsel %vm1071_vm6, %v1067_v58, 0  ;;  %v1064_v61 = vld [vmem:[%s3228_s5] sm:$0xf] }
 0x13a   : > { %2353 = vmatmul.msk.f32.vlgmr.msrb.gmra.mxu2 %vm819_vm5, %v558_v50 }
 0x13b   : > { %2355 = vmatmul.msk.f32.vlgmr.msra.gmra.mxu3 %vm819_vm5, %v583_v51 }
 0x13e   : > { %v676_v62 = vpop.f32.mrf.mxu2  ;;  %v701_v63 = vpop.f32.mrf.mxu3 }
 0x13f   : > { %v740_v1 = vpop.f32.mrf.mxu0  ;;  %v765_v2 = vpop.f32.mrf.mxu1  ;;  %v1073_v62 = vsel %vm1071_vm6, %v1064_v61, 0 }
 0x140   : > { %986 = vmatpush.msrb.mxu0 %v740_v1  ;;  %1009 = vmatpush.msra.mxu1 %v765_v2 }
 0x142   : > { %1101 = vmatpush.bf16.msrb.mxu1 %v1092_v59  ;;  %1082 = vmatpush.bf16.msra.mxu0 %v1073_v62 }
 0x146   : > { %v790_v3 = vpop.f32.mrf.mxu2  ;;  %v815_v4 = vpop.f32.mrf.mxu3 }
 0x147   : > { %1032 = vmatpush.msra.mxu2 %v790_v3  ;;  %1055 = vmatpush.msrb.mxu3 %v815_v4  ;;  %v742_v5 = vpop.f32.mrf.mxu0  ;;  %v767_v6 = vpop.f32.mrf.mxu1 }
 0x149   : > { %1120 = vmatpush.bf16.msrb.mxu2 %v1111_v56  ;;  %1139 = vmatpush.bf16.msra.mxu3 %v1130_v60 }
 0x14e   : > { %v792_v7 = vpop.f32.mrf.mxu2  ;;  %v817_v8 = vpop.f32.mrf.mxu3 }
 0x1b0   : > { %v869_v10 = vpop.f32.mrf.mxu1 }
 0x1b1   : > { %v870_v11 = vadd.f32 %v869_v10, %v2950_v9 }
 0x1b3   : > { %v927_v12 = vsel %vm819_vm5, %v870_v11, -inf }
 0x1b4   : > { %928 = vmax.xlane.f32.xlu2 %v927_v12 }
 0x1b6   : > { %v843_v13 = vpop.f32.mrf.mxu3 }
 0x1b7   : > { %v844_v21 = vadd.f32 %v843_v13, %v2950_v9 }
 0x1b9   : > { %v924_v22 = vsel %vm819_vm5, %v844_v21, -inf }
 0x1bd   : > { %v895_v14 = vpop.f32.mrf.mxu2 }
 0x1be   : > { %v896_v15 = vadd.f32 %v895_v14, %v2950_v9  ;;  %v921_v16 = vpop.f32.mrf.mxu3 }
 0x1bf   : > { %v922_v18 = vadd.f32 %v921_v16, %v2950_v9 }
 0x1c0   : > { %v930_v19 = vsel %vm819_vm5, %v896_v15, -inf }
 0x1c1   : > { %931 = vmax.xlane.f32.xlu0 %v930_v19  ;;  %v933_v20 = vsel %vm819_vm5, %v922_v18, -inf }
 0x1c2   : > { %934 = vmax.xlane.f32.xlu1 %v933_v20 }
 0x1ca   : > { %925 = vmax.xlane.f32.xlu1 %v924_v22 }
 0x227   : > { %v929_v23 = vpop.xlane.xlu2 %928 }
 0x228   : > { %v937_v28 = vsub.f32 %v870_v11, %v929_v23 }
 0x22a   : > { %v942_v31 = vmul.f32 1.442695, %v937_v28  ;;  %v2642_v28 = vld [vmem:[%s3231_s8 + $0x8] sm:$0xff] }
 0x234   : > { %v932_v24 = vpop.xlane.xlu0 %931 }
 0x235   : > { %v938_v25 = vsub.f32 %v896_v15, %v932_v24  ;;  %v935_v26 = vpop.xlane.xlu1 %934 }
 0x236   : > { %v939_v27 = vsub.f32 %v922_v18, %v935_v26 }
 0x237   : > { %v944_v29 = vmul.f32 1.442695, %v938_v25 }
 0x238   : > { %v946_v30 = vmul.f32 1.442695, %v939_v27 }
 0x239   : > { %2699 = vpow2.f32 %v944_v29  ;;  %v2641_v29 = vld [vmem:[%s3231_s8] sm:$0xff] }
 0x23a   : > { %2701 = vpow2.f32 %v946_v30 }
 0x23b   : > { %2703 = vpow2.f32 %v942_v31 }
 0x23d   : > { %v926_v32 = vpop.xlane.xlu1 %925 }
 0x23e   : > { %v936_v33 = vsub.f32 %v844_v21, %v926_v32 }
 0x23f   : > { %v2700_v34 = vpop.eup %2699 }
 0x240   : > { %v2702_v35 = vpop.eup %2701  ;;  %v940_v36 = vmul.f32 1.442695, %v936_v33  ;;  %v954_v37 = vsel %vm819_vm5, %v2700_v34, 0.0 }
 0x241   : > { %955 = vadd.xlane.f32.xlu2 %v954_v37  ;;  %v957_v38 = vsel %vm819_vm5, %v2702_v35, 0.0  ;;  %v2704_v39 = vpop.eup %2703 }
 0x242   : > { %2705 = vpow2.f32 %v940_v36  ;;  %958 = vadd.xlane.f32.xlu0 %v957_v38  ;;  %v951_v41 = vsel %vm819_vm5, %v2704_v39, 0.0  ;;  %v2690_v38 = vld [vmem:[%s3230_s7] ss:$0 sm:$0xff] }
 0x248   : > { %v2706_v40 = vpop.eup %2705 }
 0x249   : > { %952 = vadd.xlane.f32.xlu2 %v951_v41  ;;  %v948_v42 = vsel %vm819_vm5, %v2706_v40, 0.0 }
 0x24a   : > { %949 = vadd.xlane.f32.xlu1 %v948_v42 }
 0x2b4   : > { %v956_v43 = vpop.xlane.xlu2 %955 }
 0x2b5   : > { %2707 = vrcp.f32 %v956_v43  ;;  %v959_v44 = vpop.xlane.xlu0 %958  ;;  %v2646_v43 = vld [vmem:[%s3232_s9 + $0x18] sm:$0xff] }
 0x2b6   : > { %2709 = vrcp.f32 %v959_v44  ;;  %v2645_v44 = vld [vmem:[%s3232_s9 + $0x10] sm:$0xff] }
 0x2bb   : > { %v2708_v45 = vpop.eup %2707 }
 0x2bc   : > { %v2710_v46 = vpop.eup %2709  ;;  %v966_v47 = vmul.f32 %v2708_v45, %v2700_v34  ;;  %v953_v48 = vpop.xlane.xlu2 %952  ;;  %v2644_v45 = vld [vmem:[%s3232_s9 + $0x8] sm:$0xff] }
 0x2bd   : > { %v967_v49 = vmul.f32 %v2710_v46, %v2702_v35  ;;  %2711 = vrcp.f32 %v953_v48  ;;  %v950_v50 = vpop.xlane.xlu1 %949 }
 0x2be   : > { %2358 = vmatmul.msk.f32.vlgmr.msra.gmra.mxu2 %vm819_vm5, %v966_v47  ;;  %2713 = vrcp.f32 %v950_v50 }
 0x2bf   : > { %2359 = vmatmul.msk.f32.vlgmr.msrb.gmra.mxu3 %vm819_vm5, %v967_v49 }
 0x2c3   : > { %v2712_v51 = vpop.eup %2711 }
 0x2c4   : > { %v2714_v52 = vpop.eup %2713  ;;  %v965_v53 = vmul.f32 %v2712_v51, %v2704_v39  ;;  %v2643_v51 = vld [vmem:[%s3232_s9] sm:$0xff] }
 0x2c5   : > { %v964_v54 = vmul.f32 %v2714_v52, %v2706_v40 }
 0x2c6   : > { %2357 = vmatmul.msk.f32.vlgmr.msra.gmra.mxu1 %vm819_vm5, %v965_v53 }
 0x2c7   : > { %2356 = vmatmul.msk.f32.vlgmr.msrb.gmra.mxu0 %vm819_vm5, %v964_v54  ;;  %1272 = vmatpush.bf16.msra.mxu1 %v2646_v43  ;;  %v2663_v43 = vld [vmem:[%s3227_s4 + $0x40] sm:$0xff] }
 0x2c8   : > { %1199 = vmatpush.bf16.msrb.mxu0 %v2642_v28 }
 0x2cb   : > { %1273 = vmatpush.bf16.msra.mxu1 %v2645_v44  ;;  %v2665_v44 = vld [vmem:[%s3227_s4 + $0x50] sm:$0xff] }
 0x2cc   : > { %1200 = vmatpush.bf16.msrb.mxu0 %v2641_v29 }
 0x2cf   : > { %1274 = vmatpush.bf16.msra.mxu1 %v2644_v45  ;;  %v2667_v45 = vld [vmem:[%s3227_s4 + $0x60] sm:$0xff] }
 0x2d3   : > { %1275 = vmatpush.bf16.msra.mxu1 %v2643_v51 }
 0x341   : > { %v1034_v63 = vpop.f32.mrf.mxu2 }
 0x342   : > { %v1062_v1 = vpack.c.bf16 %v1034_v63, %v1034_v63  ;;  %v1057_v2 = vpop.f32.mrf.mxu3 }
 0x343   : > { %v1011_v3 = vpop.f32.mrf.mxu1  ;;  %v1063_v4 = vpack.c.bf16 %v1057_v2, %v1057_v2 }
 0x344   : > { %v1061_v5 = vpack.c.bf16 %v1011_v3, %v1011_v3  ;;  %2362 = vmatmul.msk.bf16.vlgmr.msrb.gmra.mxu2 %vm819_vm5, %v1062_v1  ;;  %v988_v6 = vpop.f32.mrf.mxu0 }
 0x345   : > { %v1060_v7 = vpack.c.bf16 %v988_v6, %v988_v6  ;;  %2363 = vmatmul.msk.bf16.vlgmr.msra.gmra.mxu3 %vm819_vm5, %v1063_v4 }
 0x346   : > { %2361 = vmatmul.msk.bf16.vlgmr.msrb.gmra.mxu1 %vm819_vm5, %v1061_v5 }
 0x347   : > { %2360 = vmatmul.msk.bf16.vlgmr.msra.gmra.mxu0 %vm819_vm5, %v1060_v7 }
 0x3c3   : > { %v1103_v8 = vpop.f32.mrf.mxu1 }
 0x3c4   : > { %v1084_v10 = vpop.f32.mrf.mxu0  ;;  %v1146_v11 = vsel %vm441_vm0, %v1103_v8, 0.0  ;;  %v2648_v8 = vld [vmem:[%s3225_s2 + $0x48] sm:$0xff] }
 0x3c5   : > { %v1145_v12 = vsel %vm441_vm0, %v1084_v10, 0.0  ;;  %v2650_v10 = vld [vmem:[%s3225_s2 + $0x58] sm:$0xff]  ;;  %1341 = vmatpush.bf16.msra.mxu2 %v2648_v8 }
 0x3c6   : > { %v1147_v13 = vadd.f32 %v1146_v11, %v1145_v12  ;;  %v2652_v11 = vld [vmem:[%s3225_s2 + $0x68] sm:$0xff]  ;;  %v2654_v12 = vld [vmem:[%s3225_s2 + $0x78] sm:$0xff]  ;;  %1366 = vmatpush.bf16.msrb.mxu3 %v2650_v10 }
 0x3c7   : > { %v1122_v14 = vpop.f32.mrf.mxu2  ;;  %1391 = vmatpush.bf16.msra.mxu0 %v2652_v11  ;;  %1416 = vmatpush.bf16.msrb.mxu1 %v2654_v12 }
 0x3c8   : > { %v1148_v15 = vsel %vm441_vm0, %v1122_v14, 0.0  ;;  %v1141_v16 = vpop.f32.mrf.mxu3  ;;  %v2649_v14 = vld [vmem:[%s3225_s2 + $0x50] sm:$0xff] }
 0x3c9   : > { %v1149_v18 = vadd.f32 %v1148_v15, %v1147_v13  ;;  %v1150_v19 = vsel %vm441_vm0, %v1141_v16, 0.0  ;;  %v2647_v13 = vld [vmem:[%s3225_s2 + $0x40] sm:$0xff]  ;;  %v2653_v16 = vld [vmem:[%s3225_s2 + $0x70] sm:$0xff] }
 0x3ca   : > { %v2651_v15 = vld [vmem:[%s3225_s2 + $0x60] sm:$0xff]  ;;  %1342 = vmatpush.bf16.msra.mxu2 %v2647_v13  ;;  %1367 = vmatpush.bf16.msrb.mxu3 %v2649_v14 }
 0x3cb   : > { %v1151_v20 = vadd.f32 %v1150_v19, %v1149_v18  ;;  %v1105_v21 = vpop.f32.mrf.mxu1  ;;  %1392 = vmatpush.bf16.msra.mxu0 %v2651_v15  ;;  %1417 = vmatpush.bf16.msrb.mxu1 %v2653_v16  ;;  %v2656_v18 = vld [vmem:[%s3226_s3 + $0x48] sm:$0xff]  ;;  %v2658_v19 = vld [vmem:[%s3226_s3 + $0x58] sm:$0xff] }
 0x3cc   : > { %v1086_v22 = vpop.f32.mrf.mxu0  ;;  %v2662_v21 = vld [vmem:[%s3226_s3 + $0x78] sm:$0xff] }
 0x3cd   : > { %v2993_v23 = vadd.f32 %v1151_v20, %v2843_v0  ;;  %v2660_v20 = vld [vmem:[%s3226_s3 + $0x68] sm:$0xff] }
 0x3ce   : > { %1458 = vmatpush.bf16.msrb.mxu2 %v2656_v18  ;;  %1483 = vmatpush.bf16.msra.mxu3 %v2658_v19 }
 0x3cf   : > { %v1124_v24 = vpop.f32.mrf.mxu2  ;;  %v1154_v25 = vmul.f32 %v2993_v23, %v2993_v23 }
 0x3d0   : > { %v1143_v26 = vpop.f32.mrf.mxu3  ;;  %v2657_v24 = vld [vmem:[%s3226_s3 + $0x50] sm:$0xff] }
 0x3d1   : > { %v1155_v27 = vsel %vm441_vm0, %v1154_v25, 0.0  ;;  %v2659_v26 = vld [vmem:[%s3226_s3 + $0x60] sm:$0xff] }
 0x3d2   : > { %1156 = vadd.xlane.f32.xlu0 %v1155_v27  ;;  %v2661_v27 = vld [vmem:[%s3226_s3 + $0x70] sm:$0xff]  ;;  %1484 = vmatpush.bf16.msra.mxu3 %v2657_v24 }
 0x445   : > { %v1157_v0 = vpop.xlane.xlu0 %1156 }
 0x446   : > { %v1158_v30 = vmul.f32 %v1157_v0, %v2872_v17 }
 0x448   : > { %v1159_v31 = vadd.f32 1e-06, %v1158_v30 }
 0x44a   : > { %2715 = vrsqrt.f32 %v1159_v31  ;;  %vm1166_vm8 = vweird.f32 %v1159_v31 }
 0x450   : > { %v2716_v32 = vpop.eup %2715 }
 0x451   : > { %v1161_v33 = vmul.f32 %v2716_v32, %v1159_v31  ;;  %vm1167_vm7 = vweird.f32 %v2716_v32 }
 0x452   : > { %vm1168_vm9 = vmor %vm1166_vm8, %vm1167_vm7 }
 0x453   : > { %v1162_v34 = vmul.f32 %v2716_v32, %v1161_v33 }
 0x455   : > { %v1163_v35 = vmul.f32 0.5, %v1162_v34  ;;  %v2691_v34 = vld [vmem:[%s3229_s6 + $0x1] ss:$0 sm:$0xff] }
 0x457   : > { %v1164_v36 = vsub.f32 1.5, %v1163_v35 }
 0x459   : > { %v1165_v37 = vmul.f32 %v2716_v32, %v1164_v36 }
 0x45b   : > { %v1169_v39 = vsel %vm1168_vm9, %v2716_v32, %v1165_v37 }
 0x45c   : > { %v1170_v40 = vmul.f32 %v1169_v39, %v2993_v23  ;;  %v2664_v39 = vld [vmem:[%s3227_s4 + $0x48] sm:$0xff] }
 0x45e   : > { %v1172_v41 = vmul.f32 %v2690_v38, %v1170_v40  ;;  %v2666_v40 = vld [vmem:[%s3227_s4 + $0x58] sm:$0xff] }
 0x460   : > { %v1173_v42 = vpack.c.bf16 %v1172_v41, %v1172_v41  ;;  %v2668_v41 = vld [vmem:[%s3227_s4 + $0x68] sm:$0xff] }
 0x462   : > { %2372 = vmatmul.msk.bf16.vlgmr.msrb.gmra.mxu0 %vm441_vm0, %v1173_v42  ;;  %v2670_v42 = vld [vmem:[%s3227_s4 + $0x78] sm:$0xff] }
 0x463   : > { %1508 = vmatpush.bf16.msrb.mxu0 %v2660_v20 }
 0x467   : > { %1509 = vmatpush.bf16.msrb.mxu0 %v2659_v26 }
 0x4df   : > { %v1202_v46 = vpop.f32.mrf.mxu0 }
 0x4e0   : > { %1227 = vrot.lane.b32.xlu1 %v1202_v46, %s2756_s16  ;;  %v2373_v48 = vmul.f32 -1.442695, %v1202_v46 }
 0x4e2   : > { %2717 = vpow2.f32 %v2373_v48 }
 0x4e7   : > { %v1204_v47 = vpop.f32.mrf.mxu0 }
 0x4e8   : > { %v2718_v49 = vpop.eup %2717 }
 0x4e9   : > { %v1209_v50 = vadd.f32 1.0, %v2718_v49 }
 0x4eb   : > { %2719 = vrcp.f32 %v1209_v50  ;;  %v1221_v57 = vand.u32 2147483648, %v1209_v50  ;;  %vm1215_vm11 = vweird.f32 %v1209_v50  ;;  %v1219_v58 = vand.u32 2147483647, %v1209_v50 }
 0x4ed   : > { %v1222_v60 = vor.u32 1.1754944e-38, %v1221_v57  ;;  %vm1220_vm13 = vcmp.eq.f32.partialorder %v1219_v58, 8.507059e+37 }
 0x4f1   : > { %v2720_v52 = vpop.eup %2719 }
 0x4f2   : > { %v1211_v53 = vmul.f32 %v2720_v52, %v1209_v50  ;;  %vm1216_vm10 = vweird.f32 %v2720_v52 }
 0x4f3   : > { %vm1217_vm12 = vmor %vm1215_vm11, %vm1216_vm10 }
 0x4f4   : > { %v1212_v54 = vsub.f32 1.0, %v1211_v53 }
 0x4f6   : > { %v1213_v55 = vmul.f32 %v2720_v52, %v1212_v54 }
 0x4f8   : > { %v1214_v56 = vadd.f32 %v2720_v52, %v1213_v55 }
 0x4fa   : > { %v1218_v59 = vsel %vm1217_vm12, %v2720_v52, %v1214_v56 }
 0x4fb   : > { %v1223_v61 = vsel %vm1220_vm13, %v1222_v60, %v1218_v59 }
 0x4fc   : > { %v1225_v62 = vmul.f32 %v1223_v61, %v1202_v46  ;;  %v2669_v46 = vld [vmem:[%s3227_s4 + $0x70] sm:$0xff] }
 0x552   : > { %v1228_v63 = vpop.permute.xlu1 %1227 }
 0x553   : > { %v1230_v1 = vmul.f32 %v1228_v63, %v1225_v62 }
 0x555   : > { %v1231_v2 = vpack.c.bf16 %v1230_v1, %v1230_v1 }
 0x557   : > { %2390 = vmatmul.msk.bf16.vlgmr.msra.gmra.mxu1 %vm1264_vm14, %v1231_v2 }
 0x558   : > { %1533 = vmatpush.bf16.msra.mxu1 %v2662_v21 }
 0x55c   : > { %1534 = vmatpush.bf16.msra.mxu1 %v2661_v27 }
 0x5d4   : > { %v1277_v3 = vpop.f32.mrf.mxu1 }
 0x5d5   : > { %v3025_v4 = vadd.f32 %v1277_v3, %v2993_v23  ;;  %v2655_v23 = vld [vmem:[%s3226_s3 + $0x40] sm:$0xff] }
 0x5d6   : > { %1459 = vmatpush.bf16.msrb.mxu2 %v2655_v23 }
 0x5d7   : > { %v1283_v5 = vmul.f32 %v3025_v4, %v3025_v4 }
 0x5d9   : > { %v1284_v6 = vsel %vm441_vm0, %v1283_v5, 0.0 }
 0x5da   : > { %1285 = vadd.xlane.f32.xlu2 %v1284_v6 }
 0x5dc   : > { %v1279_v7 = vpop.f32.mrf.mxu1 }
 0x64d   : > { %v1286_v22 = vpop.xlane.xlu2 %1285 }
 0x64e   : > { %v1287_v25 = vmul.f32 %v1286_v22, %v2872_v17 }
 0x650   : > { %v1288_v28 = vadd.f32 1e-06, %v1287_v25 }
 0x652   : > { %2721 = vrsqrt.f32 %v1288_v28  ;;  %vm1295_vm1 = vweird.f32 %v1288_v28 }
 0x658   : > { %v2722_v29 = vpop.eup %2721 }
 0x659   : > { %v1290_v0 = vmul.f32 %v2722_v29, %v1288_v28  ;;  %vm1296_vm15 = vweird.f32 %v2722_v29 }
 0x65a   : > { %vm1297_vm2 = vmor %vm1295_vm1, %vm1296_vm15 }
 0x65b   : > { %v1291_v30 = vmul.f32 %v2722_v29, %v1290_v0 }
 0x65d   : > { %v1292_v31 = vmul.f32 0.5, %v1291_v30 }
 0x65f   : > { %v1293_v32 = vsub.f32 1.5, %v1292_v31 }
 0x661   : > { %v1294_v33 = vmul.f32 %v2722_v29, %v1293_v32 }
 0x663   : > { %v1298_v35 = vsel %vm1297_vm2, %v2722_v29, %v1294_v33 }
 0x664   : > { %v1299_v36 = vmul.f32 %v1298_v35, %v3025_v4 }
 0x666   : > { %v1301_v37 = vmul.f32 %v2691_v34, %v1299_v36 }
 0x668   : > { %v1302_v38 = vpack.c.bf16 %v1301_v37, %v1301_v37 }
 0x66a   : > { %2415 = vmatmul.msk.bf16.vlgmr.msra.gmra.mxu2 %vm441_vm0, %v1302_v38  ;;  %2424 = vmatmul.msk.bf16.vlgmr.msrb.gmra.mxu3 %vm441_vm0, %v1302_v38 }
 0x66b   : > { %2433 = vmatmul.msk.bf16.vlgmr.msra.gmra.mxu0 %vm441_vm0, %v1302_v38  ;;  %2442 = vmatmul.msk.bf16.vlgmr.msrb.gmra.mxu1 %vm441_vm0, %v1302_v38 }
 0x66c   : > { %1575 = vmatpush.bf16.msra.mxu2 %v2664_v39  ;;  %1600 = vmatpush.bf16.msrb.mxu3 %v2666_v40 }
 0x66d   : > { %1625 = vmatpush.bf16.msra.mxu0 %v2668_v41  ;;  %1650 = vmatpush.bf16.msrb.mxu1 %v2670_v42 }
 0x670   : > { %1576 = vmatpush.bf16.msra.mxu2 %v2663_v43  ;;  %1601 = vmatpush.bf16.msrb.mxu3 %v2665_v44 }
 0x671   : > { %1626 = vmatpush.bf16.msra.mxu0 %v2667_v45  ;;  %1651 = vmatpush.bf16.msrb.mxu1 %v2669_v46 }
 0x67a   : > { %2467 = vmatmul.msk.bf16.vlgmr.msrb.gmra.mxu2 %vm441_vm0, %v1302_v38  ;;  %2476 = vmatmul.msk.bf16.vlgmr.msra.gmra.mxu3 %vm441_vm0, %v1302_v38 }
 0x67b   : > { %2485 = vmatmul.msk.bf16.vlgmr.msrb.gmra.mxu0 %vm441_vm0, %v1302_v38  ;;  %2494 = vmatmul.msk.bf16.vlgmr.msra.gmra.mxu1 %vm441_vm0, %v1302_v38 }
 0x68a   : > { %2519 = vmatmul.msk.bf16.vlgmr.msra.gmra.mxu2 %vm441_vm0, %v1302_v38  ;;  %2528 = vmatmul.msk.bf16.vlgmr.msrb.gmra.mxu3 %vm441_vm0, %v1302_v38 }
 0x68b   : > { %2537 = vmatmul.msk.bf16.vlgmr.msra.gmra.mxu0 %vm441_vm0, %v1302_v38  ;;  %2546 = vmatmul.msk.bf16.vlgmr.msrb.gmra.mxu1 %vm441_vm0, %v1302_v38 }
 0x6e8   : > { %v1394_v47 = vpop.f32.mrf.mxu0  ;;  %v1419_v48 = vpop.f32.mrf.mxu1 }
 0x6ed   : > { %v1344_v49 = vpop.f32.mrf.mxu2  ;;  %v1369_v50 = vpop.f32.mrf.mxu3 }
 0x6f0   : > { %v1396_v51 = vpop.f32.mrf.mxu0  ;;  %v1421_v52 = vpop.f32.mrf.mxu1 }
 0x6f5   : > { %v1346_v53 = vpop.f32.mrf.mxu2  ;;  %v1371_v54 = vpop.f32.mrf.mxu3 }
 0x6f6   : > { %v2561_v53 = vld [vmem:[%s3228_s5 + $0x18] sm:$0xf]  ;;  %v2562_v54 = vld [vmem:[%s3228_s5 + $0x1c] sm:$0xf] }
 0x6f8   : > { %v1511_v55 = vpop.f32.mrf.mxu0  ;;  %v1536_v56 = vpop.f32.mrf.mxu1 }
 0x6fd   : > { %v1461_v57 = vpop.f32.mrf.mxu2  ;;  %v1486_v58 = vpop.f32.mrf.mxu3 }
 0x6fe   : > { %2547 = vmatpush.xpose.msk.msrb.mxu2 %vm819_vm5, %v1461_v57  ;;  %2549 = vmatpush.xpose.msk.msra.mxu3 %vm819_vm5, %v1486_v58  ;;  %v2559_v57 = vld [vmem:[%s3228_s5 + $0x10] sm:$0xf]  ;;  %v2560_v58 = vld [vmem:[%s3228_s5 + $0x14] sm:$0xf] }
 0x700   : > { %v1513_v59 = vpop.f32.mrf.mxu0  ;;  %v1538_v60 = vpop.f32.mrf.mxu1 }
 0x701   : > { %2548 = vmatmul.msk.f32.vlgmr.msrb.gmra.mxu2 %vm819_vm5, %v1344_v49  ;;  %2550 = vmatmul.msk.f32.vlgmr.msra.gmra.mxu3 %vm819_vm5, %v1369_v50  ;;  %v1910_v59 = vsel %vm1071_vm6, %v2559_v57, 0  ;;  %v1929_v60 = vsel %vm1071_vm6, %v2560_v58, 0 }
 0x702   : > { %2551 = vmatpush.xpose.msk.msra.mxu2 %vm819_vm5, %v1511_v55  ;;  %2553 = vmatpush.xpose.msk.msrb.mxu3 %vm819_vm5, %v1536_v56  ;;  %v1948_v55 = vsel %vm1071_vm6, %v2561_v53, 0  ;;  %v1967_v56 = vsel %vm1071_vm6, %v2562_v54, 0 }
 0x705   : > { %v1463_v61 = vpop.f32.mrf.mxu2  ;;  %v1488_v62 = vpop.f32.mrf.mxu3 }
 0x708   : > { %v1628_v63 = vpop.f32.mrf.mxu0  ;;  %v1653_v1 = vpop.f32.mrf.mxu1 }
 0x709   : > { %1869 = vmatpush.msrb.mxu2 %v1628_v63  ;;  %1892 = vmatpush.msra.mxu3 %v1653_v1 }
 0x70a   : > { %2552 = vmatmul.msk.f32.vlgmr.msra.gmra.mxu2 %vm819_vm5, %v1394_v47  ;;  %2554 = vmatmul.msk.f32.vlgmr.msrb.gmra.mxu3 %vm819_vm5, %v1419_v48 }
 0x70b   : > { %1957 = vmatpush.bf16.msra.mxu2 %v1948_v55  ;;  %1976 = vmatpush.bf16.msrb.mxu3 %v1967_v56 }
 0x70d   : > { %v1578_v2 = vpop.f32.mrf.mxu2  ;;  %v1603_v3 = vpop.f32.mrf.mxu3 }
 0x70e   : > { %1823 = vmatpush.msrb.mxu0 %v1578_v2  ;;  %1846 = vmatpush.msra.mxu1 %v1603_v3 }
 0x710   : > { %v1630_v5 = vpop.f32.mrf.mxu0  ;;  %v1655_v6 = vpop.f32.mrf.mxu1  ;;  %1919 = vmatpush.bf16.msra.mxu0 %v1910_v59  ;;  %1938 = vmatpush.bf16.msrb.mxu1 %v1929_v60 }
 0x715   : > { %v1580_v7 = vpop.f32.mrf.mxu2  ;;  %v1605_v8 = vpop.f32.mrf.mxu3 }
 0x784   : > { %v1680_v10 = vpop.f32.mrf.mxu2  ;;  %v1706_v11 = vpop.f32.mrf.mxu3 }
 0x785   : > { %v1681_v19 = vadd.f32 %v1680_v10, %v2950_v9  ;;  %v1707_v20 = vadd.f32 %v1706_v11, %v2950_v9 }
 0x787   : > { %v1764_v21 = vsel %vm819_vm5, %v1707_v20, -inf  ;;  %v1761_v22 = vsel %vm819_vm5, %v1681_v19, -inf }
 0x78d   : > { %v1732_v12 = vpop.f32.mrf.mxu2  ;;  %v1758_v13 = vpop.f32.mrf.mxu3 }
 0x78e   : > { %v1733_v14 = vadd.f32 %v1732_v12, %v2950_v9  ;;  %v1759_v15 = vadd.f32 %v1758_v13, %v2950_v9 }
 0x790   : > { %v1770_v16 = vsel %vm819_vm5, %v1759_v15, -inf  ;;  %v1767_v18 = vsel %vm819_vm5, %v1733_v14, -inf }
 0x791   : > { %1771 = vmax.xlane.f32.xlu2 %v1770_v16  ;;  %1768 = vmax.xlane.f32.xlu0 %v1767_v18 }
 0x799   : > { %1765 = vmax.xlane.f32.xlu2 %v1764_v21  ;;  %1762 = vmax.xlane.f32.xlu0 %v1761_v22 }
 0x804   : > { %v1772_v23 = vpop.xlane.xlu2 %1771  ;;  %v1769_v24 = vpop.xlane.xlu0 %1768 }
 0x805   : > { %v1776_v25 = vsub.f32 %v1759_v15, %v1772_v23  ;;  %v1775_v26 = vsub.f32 %v1733_v14, %v1769_v24 }
 0x807   : > { %v1783_v27 = vmul.f32 1.442695, %v1776_v25  ;;  %v1781_v28 = vmul.f32 1.442695, %v1775_v26 }
 0x809   : > { %2723 = vpow2.f32 %v1783_v27  ;;  %v2672_v27 = vld [vmem:[%s3231_s8 + $0x18] sm:$0xff] }
 0x80a   : > { %2725 = vpow2.f32 %v1781_v28  ;;  %v2671_v28 = vld [vmem:[%s3231_s8 + $0x10] sm:$0xff] }
 0x80c   : > { %v1766_v29 = vpop.xlane.xlu2 %1765  ;;  %v1763_v0 = vpop.xlane.xlu0 %1762 }
 0x80d   : > { %v1774_v30 = vsub.f32 %v1707_v20, %v1766_v29  ;;  %v1773_v31 = vsub.f32 %v1681_v19, %v1763_v0 }
 0x80f   : > { %v2724_v32 = vpop.eup %2723  ;;  %v1779_v9 = vmul.f32 1.442695, %v1774_v30  ;;  %v1777_v33 = vmul.f32 1.442695, %v1773_v31 }
 0x810   : > { %v2726_v34 = vpop.eup %2725  ;;  %v1794_v35 = vsel %vm819_vm5, %v2724_v32, 0.0 }
 0x811   : > { %2727 = vpow2.f32 %v1779_v9  ;;  %1795 = vadd.xlane.f32.xlu2 %v1794_v35  ;;  %v1791_v36 = vsel %vm819_vm5, %v2726_v34, 0.0  ;;  %v2692_v35 = vld [vmem:[%s3230_s7 + $0x1] ss:$0 sm:$0xff] }
 0x812   : > { %2729 = vpow2.f32 %v1777_v33  ;;  %1792 = vadd.xlane.f32.xlu0 %v1791_v36 }
 0x817   : > { %v2728_v37 = vpop.eup %2727 }
 0x818   : > { %v2730_v38 = vpop.eup %2729  ;;  %v1788_v39 = vsel %vm819_vm5, %v2728_v37, 0.0 }
 0x819   : > { %v1785_v40 = vsel %vm819_vm5, %v2730_v38, 0.0 }
 0x81a   : > { %1789 = vadd.xlane.f32.xlu0 %v1788_v39  ;;  %1786 = vadd.xlane.f32.xlu1 %v1785_v40  ;;  %v2676_v40 = vld [vmem:[%s3232_s9 + $0x38] sm:$0xff] }
 0x884   : > { %v1796_v41 = vpop.xlane.xlu2 %1795 }
 0x885   : > { %2731 = vrcp.f32 %v1796_v41  ;;  %v1793_v42 = vpop.xlane.xlu0 %1792  ;;  %v2675_v41 = vld [vmem:[%s3232_s9 + $0x30] sm:$0xff] }
 0x886   : > { %2733 = vrcp.f32 %v1793_v42  ;;  %v2674_v42 = vld [vmem:[%s3232_s9 + $0x28] sm:$0xff] }
 0x88b   : > { %v2732_v43 = vpop.eup %2731 }
 0x88c   : > { %v2734_v44 = vpop.eup %2733  ;;  %v1804_v45 = vmul.f32 %v2732_v43, %v2724_v32 }
 0x88d   : > { %v1803_v46 = vmul.f32 %v2734_v44, %v2726_v34  ;;  %v1787_v47 = vpop.xlane.xlu1 %1786  ;;  %v1790_v48 = vpop.xlane.xlu0 %1789 }
 0x88e   : > { %2735 = vrcp.f32 %v1787_v47  ;;  %2558 = vmatmul.msk.f32.vlgmr.msra.gmra.mxu3 %vm819_vm5, %v1804_v45 }
 0x88f   : > { %2737 = vrcp.f32 %v1790_v48  ;;  %2557 = vmatmul.msk.f32.vlgmr.msrb.gmra.mxu2 %vm819_vm5, %v1803_v46  ;;  %v2673_v48 = vld [vmem:[%s3232_s9 + $0x20] sm:$0xff] }
 0x894   : > { %v2736_v49 = vpop.eup %2735 }
 0x895   : > { %v2738_v50 = vpop.eup %2737  ;;  %v1801_v51 = vmul.f32 %v2736_v49, %v2730_v38 }
 0x896   : > { %v1802_v52 = vmul.f32 %v2738_v50, %v2728_v37 }
 0x897   : > { %2555 = vmatmul.msk.f32.vlgmr.msrb.gmra.mxu0 %vm819_vm5, %v1801_v51 }
 0x898   : > { %2556 = vmatmul.msk.f32.vlgmr.msra.gmra.mxu1 %vm819_vm5, %v1802_v52  ;;  %2037 = vmatpush.bf16.msrb.mxu0 %v2672_v27 }
 0x899   : > { %2110 = vmatpush.bf16.msra.mxu1 %v2676_v40 }
 0x89c   : > { %2038 = vmatpush.bf16.msrb.mxu0 %v2671_v28 }
 0x89d   : > { %2111 = vmatpush.bf16.msra.mxu1 %v2675_v41 }
 0x8a1   : > { %2112 = vmatpush.bf16.msra.mxu1 %v2674_v42 }
 0x8a5   : > { %2113 = vmatpush.bf16.msra.mxu1 %v2673_v48 }
 0x911   : > { %v1894_v61 = vpop.f32.mrf.mxu3 }
 0x912   : > { %v1871_v62 = vpop.f32.mrf.mxu2  ;;  %v1900_v63 = vpack.c.bf16 %v1894_v61, %v1894_v61 }
 0x913   : > { %v1899_v1 = vpack.c.bf16 %v1871_v62, %v1871_v62 }
 0x914   : > { %v1825_v2 = vpop.f32.mrf.mxu0  ;;  %2566 = vmatmul.msk.bf16.vlgmr.msrb.gmra.mxu3 %vm819_vm5, %v1900_v63 }
 0x915   : > { %v1897_v3 = vpack.c.bf16 %v1825_v2, %v1825_v2  ;;  %v1848_v5 = vpop.f32.mrf.mxu1  ;;  %2565 = vmatmul.msk.bf16.vlgmr.msra.gmra.mxu2 %vm819_vm5, %v1899_v1 }
 0x916   : > { %v1898_v6 = vpack.c.bf16 %v1848_v5, %v1848_v5 }
 0x917   : > { %2563 = vmatmul.msk.bf16.vlgmr.msra.gmra.mxu0 %vm819_vm5, %v1897_v3 }
 0x918   : > { %2564 = vmatmul.msk.bf16.vlgmr.msrb.gmra.mxu1 %vm819_vm5, %v1898_v6  ;;  %v2678_v6 = vld [vmem:[%s3234_s11 + $0x8] sm:$0xff] }
 0x919   : > { %2172 = vmatpush.bf16.msrb.mxu2 %v2678_v6 }
 0x994   : > { %v1921_v7 = vpop.f32.mrf.mxu0 }
 0x995   : > { %v1982_v8 = vsel %vm441_vm0, %v1921_v7, 0.0  ;;  %v1940_v10 = vpop.f32.mrf.mxu1  ;;  %v2677_v7 = vld [vmem:[%s3234_s11] sm:$0xff] }
 0x996   : > { %v1983_v11 = vsel %vm441_vm0, %v1940_v10, 0.0  ;;  %2173 = vmatpush.bf16.msrb.mxu2 %v2677_v7 }
 0x997   : > { %v1978_v12 = vpop.f32.mrf.mxu3  ;;  %v1984_v13 = vadd.f32 %v1983_v11, %v1982_v8 }
 0x998   : > { %v1959_v14 = vpop.f32.mrf.mxu2  ;;  %v1987_v18 = vsel %vm441_vm0, %v1978_v12, 0.0 }
 0x999   : > { %v1985_v15 = vsel %vm441_vm0, %v1959_v14, 0.0 }
 0x99a   : > { %v1986_v16 = vadd.f32 %v1985_v15, %v1984_v13 }
 0x99c   : > { %v1988_v19 = vadd.f32 %v1987_v18, %v1986_v16  ;;  %v1923_v20 = vpop.f32.mrf.mxu0 }
 0x99d   : > { %v1942_v21 = vpop.f32.mrf.mxu1 }
 0x99e   : > { %v3168_v22 = vadd.f32 %v1988_v19, %v3025_v4  ;;  %v2693_v19 = vld [vmem:[%s3233_s10] ss:$0 sm:$0xff] }
 0x99f   : > { %v1980_v23 = vpop.f32.mrf.mxu3 }
 0x9a0   : > { %v1961_v24 = vpop.f32.mrf.mxu2  ;;  %v1991_v25 = vmul.f32 %v3168_v22, %v3168_v22  ;;  %v2694_v23 = vld [vmem:[%s3235_s12] ss:$0 sm:$0xff] }
 0x9a2   : > { %v1992_v26 = vsel %vm441_vm0, %v1991_v25, 0.0 }
 0x9a3   : > { %1993 = vadd.xlane.f32.xlu2 %v1992_v26 }
 0xa16   : > { %v1994_v4 = vpop.xlane.xlu2 %1993 }
 0xa17   : > { %v1995_v29 = vmul.f32 %v1994_v4, %v2872_v17 }
 0xa19   : > { %v1996_v0 = vadd.f32 1e-06, %v1995_v29 }
 0xa1b   : > { %2739 = vrsqrt.f32 %v1996_v0  ;;  %vm2003_vm4 = vweird.f32 %v1996_v0 }
 0xa21   : > { %v2740_v30 = vpop.eup %2739 }
 0xa22   : > { %v1998_v31 = vmul.f32 %v2740_v30, %v1996_v0  ;;  %vm2004_vm3 = vweird.f32 %v2740_v30 }
 0xa23   : > { %vm2005_vm5 = vmor %vm2003_vm4, %vm2004_vm3 }
 0xa24   : > { %v1999_v32 = vmul.f32 %v2740_v30, %v1998_v31 }
 0xa26   : > { %v2000_v9 = vmul.f32 0.5, %v1999_v32 }
 0xa28   : > { %v2001_v33 = vsub.f32 1.5, %v2000_v9 }
 0xa2a   : > { %v2002_v34 = vmul.f32 %v2740_v30, %v2001_v33 }
 0xa2c   : > { %v2006_v36 = vsel %vm2005_vm5, %v2740_v30, %v2002_v34 }
 0xa2d   : > { %v2007_v37 = vmul.f32 %v2006_v36, %v3168_v22 }
 0xa2f   : > { %v2009_v38 = vmul.f32 %v2692_v35, %v2007_v37 }
 0xa31   : > { %v2010_v39 = vpack.c.bf16 %v2009_v38, %v2009_v38 }
 0xa33   : > { %2579 = vmatmul.msk.bf16.vlgmr.msrb.gmra.mxu0 %vm441_vm0, %v2010_v39 }
 0xab0   : > { %v2040_v43 = vpop.f32.mrf.mxu0 }
 0xab1   : > { %2065 = vrot.lane.b32.xlu0 %v2040_v43, %s2756_s16  ;;  %v2580_v45 = vmul.f32 -1.442695, %v2040_v43 }
 0xab3   : > { %2741 = vpow2.f32 %v2580_v45 }
 0xab8   : > { %v2042_v44 = vpop.f32.mrf.mxu0 }
 0xab9   : > { %v2742_v46 = vpop.eup %2741 }
 0xaba   : > { %v2047_v47 = vadd.f32 1.0, %v2742_v46 }
 0xabc   : > { %2743 = vrcp.f32 %v2047_v47  ;;  %v2059_v54 = vand.u32 2147483648, %v2047_v47  ;;  %vm2053_vm7 = vweird.f32 %v2047_v47  ;;  %v2057_v55 = vand.u32 2147483647, %v2047_v47 }
 0xabe   : > { %v2060_v57 = vor.u32 1.1754944e-38, %v2059_v54  ;;  %vm2058_vm9 = vcmp.eq.f32.partialorder %v2057_v55, 8.507059e+37 }
 0xac2   : > { %v2744_v49 = vpop.eup %2743 }
 0xac3   : > { %v2049_v50 = vmul.f32 %v2744_v49, %v2047_v47  ;;  %vm2054_vm6 = vweird.f32 %v2744_v49 }
 0xac4   : > { %vm2055_vm8 = vmor %vm2053_vm7, %vm2054_vm6 }
 0xac5   : > { %v2050_v51 = vsub.f32 1.0, %v2049_v50 }
 0xac7   : > { %v2051_v52 = vmul.f32 %v2744_v49, %v2050_v51 }
 0xac9   : > { %v2052_v53 = vadd.f32 %v2744_v49, %v2051_v52 }
 0xacb   : > { %v2056_v56 = vsel %vm2055_vm8, %v2744_v49, %v2052_v53 }
 0xacc   : > { %v2061_v58 = vsel %vm2058_vm9, %v2060_v57, %v2056_v56 }
 0xacd   : > { %v2063_v59 = vmul.f32 %v2061_v58, %v2040_v43 }
 0xb23   : > { %v2066_v60 = vpop.permute.xlu0 %2065 }
 0xb24   : > { %v2068_v61 = vmul.f32 %v2066_v60, %v2063_v59 }
 0xb26   : > { %v2069_v62 = vpack.c.bf16 %v2068_v61, %v2068_v61 }
 0xb28   : > { %2605 = vmatmul.msk.bf16.vlgmr.msra.gmra.mxu1 %vm1264_vm14, %v2069_v62 }
 0xba5   : > { %v2115_v63 = vpop.f32.mrf.mxu1 }
 0xba6   : > { %v2119_v1 = vadd.f32 %v2115_v63, %v3168_v22 }
 0xba8   : > { %v2121_v2 = vmul.f32 %v2119_v1, %v2119_v1 }
 0xbaa   : > { %v2122_v3 = vsel %vm441_vm0, %v2121_v2, 0.0 }
 0xbab   : > { %2123 = vadd.xlane.f32.xlu2 %v2122_v3 }
 0xbad   : > { %v2117_v5 = vpop.f32.mrf.mxu1 }
 0xc1e   : > { %v2124_v8 = vpop.xlane.xlu2 %2123 }
 0xc1f   : > { %v2125_v10 = vmul.f32 %v2124_v8, %v2872_v17 }
 0xc21   : > { %v2126_v11 = vadd.f32 1e-06, %v2125_v10 }
 0xc23   : > { %2745 = vrsqrt.f32 %v2126_v11  ;;  %vm2133_vm11 = vweird.f32 %v2126_v11 }
 0xc29   : > { %v2746_v12 = vpop.eup %2745 }
 0xc2a   : > { %v2128_v13 = vmul.f32 %v2746_v12, %v2126_v11  ;;  %vm2134_vm10 = vweird.f32 %v2746_v12 }
 0xc2b   : > { %vm2135_vm12 = vmor %vm2133_vm11, %vm2134_vm10 }
 0xc2c   : > { %v2129_v14 = vmul.f32 %v2746_v12, %v2128_v13 }
 0xc2e   : > { %v2130_v15 = vmul.f32 0.5, %v2129_v14 }
 0xc30   : > { %v2131_v16 = vsub.f32 1.5, %v2130_v15 }
 0xc32   : > { %v2132_v18 = vmul.f32 %v2746_v12, %v2131_v16 }
 0xc34   : > { %v2136_v20 = vsel %vm2135_vm12, %v2746_v12, %v2132_v18 }
 0xc35   : > { %v2137_v21 = vmul.f32 %v2136_v20, %v2119_v1 }
 0xc37   : > { %v2141_v22 = vmul.f32 %v2693_v19, %v2137_v21 }
 0xc39   : > { %v2142_v17 = vpack.c.bf16 %v2141_v22, %v2141_v22 }
 0xc3b   : > { %2614 = vmatmul.msk.bf16.vlgmr.msrb.gmra.mxu2 %vm441_vm0, %v2142_v17 }
 0xcbe   : > { %v2175_v24 = vpop.f32.mrf.mxu2 }
 0xcbf   : > { %v2176_v25 = vadd.f32 %v2694_v23, %v2175_v24 }
 0xcc1   : > { %2179 = vst [vmem:[%s435_s22] sm:$0xff] %v2176_v25 }
 0xcc6   : > { %v2177_v26 = vpop.f32.mrf.mxu2 }
 0xcc7 PF: > { %s23_s25 = sadd.s32 1, %s2753_s25  }
 0xcc8   : > { %p20_p4 = scmp.ge.s32.totalorder %s23_s25, 4  }
 0xcca   :  { %22 = sbr.rel (!%p20_p4) target bundleno = 1 (0x1), region = 108 }

</bundles_post_ra>
